<compile_context>
chip_gen: v7x
topology: tpu7x:2x2x1
jax: 0.10.0
libtpu: 0.0.40
codegen_flags: <defaults>
</compile_context>

<pallas_src>
import jax
import jax.numpy as jnp
from jax.experimental import pallas as pl
from jax.experimental.pallas import tpu as pltpu


def proc_kernel(z_ref, pm_ref, wf_ref, b12_ref, wum_ref, bu_ref, o_ref):
    BT, K, Z = z_ref.shape
    H = o_ref.shape[-1]

    # Flatten batch*set rows for the MXU; K == 8 keeps this a free relayout.
    zf = z_ref[...].reshape(BT * K, Z)                    # (BT*K, Z)

    # One fused matmul: [M1 | M2 | Uz] -> (BT*K, 2Z + H)
    fused = jnp.dot(zf, wf_ref[...], preferred_element_type=jnp.float32)
    m1z = (fused[:, :Z] + b12_ref[...]).reshape(BT, K, Z)  # bias b1+b2 folded here
    m2z = fused[:, Z:2 * Z].reshape(BT, K, Z)              # no bias (already folded)
    uz = fused[:, 2 * Z:]                                  # z @ Wu[:, :Z].T, (BT*K, H)

    # Pairwise relu(m1z[i] + m2z[j]) masked by 0/1 adjacency, max over j.
    s = jnp.maximum(m1z[:, :, None, :] + m2z[:, None, :, :], 0.0)   # (BT,K,K,Z)
    m = jnp.max(s * pm_ref[...][:, :, :, None], axis=2)             # (BT,K,Z)

    out = (uz
           + jnp.dot(m.reshape(BT * K, Z), wum_ref[...],
                     preferred_element_type=jnp.float32)
           + bu_ref[...])
    o_ref[...] = jnp.maximum(out, 0.0).reshape(BT, K, H)


def _pick_bt(B, max_bt=8):
    bt = min(B, max_bt)
    while B % bt:
        bt -= 1
    return bt


def proc_forward(z, P, params, block_b=None):
    """z: (B, K, Z) f32, P: (B, K, K) f32, params: dict of weights."""
    B, K, Z = z.shape
    H = params["bu"].shape[-1]
    BT = block_b if block_b is not None else _pick_bt(B)
    assert B % BT == 0

    # Weight prep (outside the kernel): pre-transpose to (in, out) and fuse.
    w1t = params["w1"].T                       # (Z, Z)
    w2t = params["w2"].T                       # (Z, Z)
    wuz = params["wu"][:, :Z].T                # (Z, H)
    wum = params["wu"][:, Z:].T                # (Z, H)
    w_fused = jnp.concatenate([w1t, w2t, wuz], axis=1)   # (Z, 2Z + H)
    b12 = (params["b1"] + params["b2"]).reshape(1, Z)    # folded M1+M2 bias
    bu = params["bu"].reshape(1, H)

    # Pre-transposed 0/1 mask: pmask[b, i, j] = (P[b, j, i] != 0)
    pmask = (jnp.swapaxes(P, 1, 2) != 0.0).astype(jnp.float32)

    full = lambda shape: pl.BlockSpec(shape, lambda b: (0,) * len(shape))

    return pl.pallas_call(
        proc_kernel,
        out_shape=jax.ShapeDtypeStruct((B, K, H), jnp.float32),
        grid_spec=pltpu.PrefetchScalarGridSpec(
            num_scalar_prefetch=0,
            grid=(B // BT,),
            in_specs=[
                pl.BlockSpec((BT, K, Z), lambda b: (b, 0, 0)),   # z
                pl.BlockSpec((BT, K, K), lambda b: (b, 0, 0)),   # pmask
                full((Z, 2 * Z + H)),                            # fused [M1|M2|Uz]
                full((1, Z)),                                    # b1 + b2
                full((Z, H)),                                    # Um (m-half of U)
                full((1, H)),                                    # bu
            ],
            out_specs=pl.BlockSpec((BT, K, H), lambda b: (b, 0, 0)),
        ),
        compiler_params=pltpu.CompilerParams(
            dimension_semantics=("parallel",)),
    )(z, pmask, w_fused, b12, wum, bu)


def proc_reference(z, P, params):
    """Pure-JAX reference matching the PyTorch forward."""
    m1z = z @ params["w1"].T + params["b1"]
    m2z = z @ params["w2"].T + params["b2"]
    s = jnp.maximum(m1z[:, :, None, :] + m2z[:, None, :, :], 0.0)   # (B,K,K,Z)
    mask = (jnp.swapaxes(P, 1, 2) != 0.0)[..., None]                # (B,Ki,Kj,1)
    m = jnp.max(jnp.where(mask, s, -jnp.inf), axis=2)               # (B,K,Z)
    u_in = jnp.concatenate([z, m], axis=-1)
    return jnp.maximum(u_in @ params["wu"].T + params["bu"], 0.0)


if __name__ == "__main__":
    enc_size = 32
    hidden_size = 32
    B, K = 16, 8   # grid = (2,) with BT=8 -> keeps both v7x TensorCores busy

    key = jax.random.PRNGKey(0)
    ks = jax.random.split(key, 8)

    # Deterministic synthetic parameters (shapes match nn.Linear in __init__).
    params = {
        "w1": jax.random.normal(ks[0], (enc_size, enc_size), jnp.float32) * 0.1,
        "b1": jax.random.normal(ks[1], (enc_size,), jnp.float32) * 0.1,
        "w2": jax.random.normal(ks[2], (enc_size, enc_size), jnp.float32) * 0.1,
        "b2": jax.random.normal(ks[3], (enc_size,), jnp.float32) * 0.1,
        "wu": jax.random.normal(ks[4], (hidden_size, enc_size * 2), jnp.float32) * 0.1,
        "bu": jax.random.normal(ks[5], (hidden_size,), jnp.float32) * 0.1,
    }

    z = jax.random.normal(ks[6], (B, K, enc_size), jnp.float32)
    # Random 0/1 adjacency; force diagonal to 1 so every column has a nonzero
    # (the PyTorch loop assumes a non-empty index set J).
    P = jax.random.bernoulli(ks[7], 0.4, (B, K, K)).astype(jnp.float32)
    P = jnp.maximum(P, jnp.eye(K, dtype=jnp.float32)[None])

    out = proc_forward(z, P, params)
    jax.block_until_ready(out)

    ref = proc_reference(z, P, params)
    assert out.shape == (B, K, hidden_size)
    assert jnp.allclose(out, ref, atol=1e-5, rtol=1e-5), "mismatch vs reference"

    print("KERNEL_OK")
</pallas_src>

<mosaic_0001>
module attributes {stable_mosaic.version = 11 : i64} {
  func.func @proc_kernel(%arg0: i32, %arg1: memref<8x8x32xf32, #tpu.memory_space<vmem>>, %arg2: memref<8x8x8xf32, #tpu.memory_space<vmem>>, %arg3: memref<32x96xf32, #tpu.memory_space<vmem>>, %arg4: memref<1x32xf32, #tpu.memory_space<vmem>>, %arg5: memref<32x32xf32, #tpu.memory_space<vmem>>, %arg6: memref<1x32xf32, #tpu.memory_space<vmem>>, %arg7: memref<8x8x32xf32, #tpu.memory_space<vmem>>) attributes {dimension_semantics = [#tpu.dimension_semantics<parallel>], iteration_bounds = array<i64: 2>, scalar_prefetch = 0 : i64, scratch_operands = 0 : i64, tpu.core_type = #tpu.core_type<tc>, window_params = [{transform_indices = @transform_0, window_bounds = array<i64: 8, 8, 32>}, {transform_indices = @transform_1, window_bounds = array<i64: 8, 8, 8>}, {pipeline_mode = #tpu.pipeline_mode<synchronous>, transform_indices = @transform_2, window_bounds = array<i64: 32, 96>}, {pipeline_mode = #tpu.pipeline_mode<synchronous>, transform_indices = @transform_3, window_bounds = array<i64: 1, 32>}, {pipeline_mode = #tpu.pipeline_mode<synchronous>, transform_indices = @transform_4, window_bounds = array<i64: 32, 32>}, {pipeline_mode = #tpu.pipeline_mode<synchronous>, transform_indices = @transform_5, window_bounds = array<i64: 1, 32>}, {transform_indices = @transform_6, window_bounds = array<i64: 8, 8, 32>}]} {
    %c0 = arith.constant 0 : index
    %c0_0 = arith.constant 0 : index
    %c0_1 = arith.constant 0 : index
    %0 = vector.load %arg1[%c0, %c0_0, %c0_1] : memref<8x8x32xf32, #tpu.memory_space<vmem>>, vector<8x8x32xf32>
    %1 = vector.shape_cast %0 : vector<8x8x32xf32> to vector<64x32xf32>
    %c0_2 = arith.constant 0 : index
    %c0_3 = arith.constant 0 : index
    %2 = vector.load %arg3[%c0_2, %c0_3] : memref<32x96xf32, #tpu.memory_space<vmem>>, vector<32x96xf32>
    %cst = arith.constant dense<0.000000e+00> : vector<64x96xf32>
    %3 = tpu.matmul %1, %2, %cst {dimension_numbers = #tpu.dot_dimension_numbers<[1], [0], [0], [1], [0, 0, 1, 1], [], []>} : vector<64x32xf32>, vector<32x96xf32>, vector<64x96xf32> -> vector<64x96xf32>
    %4 = vector.extract_strided_slice %3 {offsets = [0, 0], sizes = [64, 32], strides = [1, 1]} : vector<64x96xf32> to vector<64x32xf32>
    %c0_4 = arith.constant 0 : index
    %c0_5 = arith.constant 0 : index
    %5 = vector.load %arg4[%c0_4, %c0_5] : memref<1x32xf32, #tpu.memory_space<vmem>>, vector<1x32xf32>
    %6 = vector.broadcast %5 : vector<1x32xf32> to vector<64x32xf32>
    %7 = arith.addf %4, %6 : vector<64x32xf32>
    %8 = vector.shape_cast %7 : vector<64x32xf32> to vector<8x8x32xf32>
    %9 = vector.extract_strided_slice %3 {offsets = [0, 32], sizes = [64, 32], strides = [1, 1]} : vector<64x96xf32> to vector<64x32xf32>
    %10 = vector.shape_cast %9 : vector<64x32xf32> to vector<8x8x32xf32>
    %11 = vector.extract_strided_slice %3 {offsets = [0, 64], sizes = [64, 32], strides = [1, 1]} : vector<64x96xf32> to vector<64x32xf32>
    %12 = vector.shape_cast %8 : vector<8x8x32xf32> to vector<8x8x1x32xf32>
    %13 = vector.shape_cast %10 : vector<8x8x32xf32> to vector<8x1x8x32xf32>
    %14 = vector.broadcast %12 : vector<8x8x1x32xf32> to vector<8x8x8x32xf32>
    %15 = vector.broadcast %13 : vector<8x1x8x32xf32> to vector<8x8x8x32xf32>
    %16 = arith.addf %14, %15 : vector<8x8x8x32xf32>
    %cst_6 = arith.constant 0.000000e+00 : f32
    %17 = vector.broadcast %cst_6 : f32 to vector<8x8x8x32xf32>
    %18 = arith.maximumf %16, %17 : vector<8x8x8x32xf32>
    %c0_7 = arith.constant 0 : index
    %c0_8 = arith.constant 0 : index
    %c0_9 = arith.constant 0 : index
    %19 = vector.load %arg2[%c0_7, %c0_8, %c0_9] : memref<8x8x8xf32, #tpu.memory_space<vmem>>, vector<8x8x8xf32>
    %20 = vector.shape_cast %19 : vector<8x8x8xf32> to vector<8x8x8x1xf32>
    %21 = vector.broadcast %20 : vector<8x8x8x1xf32> to vector<8x8x8x32xf32>
    %22 = arith.mulf %18, %21 : vector<8x8x8x32xf32>
    %cst_10 = arith.constant dense<0xFF800000> : vector<8x8x32xf32>
    %23 = vector.multi_reduction <maximumf>, %22, %cst_10 [2] : vector<8x8x8x32xf32> to vector<8x8x32xf32>
    %24 = vector.shape_cast %23 : vector<8x8x32xf32> to vector<64x32xf32>
    %c0_11 = arith.constant 0 : index
    %c0_12 = arith.constant 0 : index
    %25 = vector.load %arg5[%c0_11, %c0_12] : memref<32x32xf32, #tpu.memory_space<vmem>>, vector<32x32xf32>
    %cst_13 = arith.constant dense<0.000000e+00> : vector<64x32xf32>
    %26 = tpu.matmul %24, %25, %cst_13 {dimension_numbers = #tpu.dot_dimension_numbers<[1], [0], [0], [1], [0, 0, 1, 1], [], []>} : vector<64x32xf32>, vector<32x32xf32>, vector<64x32xf32> -> vector<64x32xf32>
    %27 = arith.addf %11, %26 : vector<64x32xf32>
    %c0_14 = arith.constant 0 : index
    %c0_15 = arith.constant 0 : index
    %28 = vector.load %arg6[%c0_14, %c0_15] : memref<1x32xf32, #tpu.memory_space<vmem>>, vector<1x32xf32>
    %29 = vector.broadcast %28 : vector<1x32xf32> to vector<64x32xf32>
    %30 = arith.addf %27, %29 : vector<64x32xf32>
    %cst_16 = arith.constant 0.000000e+00 : f32
    %31 = vector.broadcast %cst_16 : f32 to vector<64x32xf32>
    %32 = arith.maximumf %30, %31 : vector<64x32xf32>
    %33 = vector.shape_cast %32 : vector<64x32xf32> to vector<8x8x32xf32>
    %c0_17 = arith.constant 0 : index
    %c0_18 = arith.constant 0 : index
    %c0_19 = arith.constant 0 : index
    %34 = vector.load %arg7[%c0_17, %c0_18, %c0_19] : memref<8x8x32xf32, #tpu.memory_space<vmem>>, vector<8x8x32xf32>
    tpu.vector_store %arg7[%c0_17, %c0_18, %c0_19], %33 {strides = array<i32>} : memref<8x8x32xf32, #tpu.memory_space<vmem>>, vector<8x8x32xf32>,
    return
  }
  func.func @transform_0(%arg0: i32) -> (i32, i32, i32) {
    %c0_i32 = arith.constant 0 : i32
    %c0_i32_0 = arith.constant 0 : i32
    %c0_i32_1 = arith.constant 0 : i32
    return %arg0, %c0_i32, %c0_i32_0 : i32, i32, i32
  }
  func.func @transform_1(%arg0: i32) -> (i32, i32, i32) {
    %c0_i32 = arith.constant 0 : i32
    %c0_i32_0 = arith.constant 0 : i32
    %c0_i32_1 = arith.constant 0 : i32
    return %arg0, %c0_i32, %c0_i32_0 : i32, i32, i32
  }
  func.func @transform_2(%arg0: i32) -> (i32, i32) {
    %c0_i32 = arith.constant 0 : i32
    %c0_i32_0 = arith.constant 0 : i32
    %c0_i32_1 = arith.constant 0 : i32
    return %c0_i32, %c0_i32_0 : i32, i32
  }
  func.func @transform_3(%arg0: i32) -> (i32, i32) {
    %c0_i32 = arith.constant 0 : i32
    %c0_i32_0 = arith.constant 0 : i32
    %c0_i32_1 = arith.constant 0 : i32
    return %c0_i32, %c0_i32_0 : i32, i32
  }
  func.func @transform_4(%arg0: i32) -> (i32, i32) {
    %c0_i32 = arith.constant 0 : i32
    %c0_i32_0 = arith.constant 0 : i32
    %c0_i32_1 = arith.constant 0 : i32
    return %c0_i32, %c0_i32_0 : i32, i32
  }
  func.func @transform_5(%arg0: i32) -> (i32, i32) {
    %c0_i32 = arith.constant 0 : i32
    %c0_i32_0 = arith.constant 0 : i32
    %c0_i32_1 = arith.constant 0 : i32
    return %c0_i32, %c0_i32_0 : i32, i32
  }
  func.func @transform_6(%arg0: i32) -> (i32, i32, i32) {
    %c0_i32 = arith.constant 0 : i32
    %c0_i32_0 = arith.constant 0 : i32
    %c0_i32_1 = arith.constant 0 : i32
    return %arg0, %c0_i32, %c0_i32_0 : i32, i32, i32
  }
}

</mosaic_0001>

<bundles_post_ra>
// kernel: tpu_custom_call.1
= control target key start
LH: loop header
LB: loop body
LE: loop exit
PB: predicated region body
PF: predicated region fallthrough
CT: control target
= control target key end

     0   :  { %11 = vsyncpa [#allocation3], 0  ;;  %s4413_s0 = inlined_call_operand.vmem [shape: f32[16,8,32], index: 0, kind: input, shape index: {}]   ;;  %s4414_s1 = inlined_call_operand.vmem [shape: f32[16,8,8], index: 1, kind: input, shape index: {}]   ;;  %s4415_s2 = inlined_call_operand.vmem [shape: f32[32,96], index: 2, kind: input, shape index: {}]   ;;  %s4416_s3 = inlined_call_operand.vmem [shape: f32[1,32], index: 3, kind: input, shape index: {}]   ;;  %s4417_s4 = inlined_call_operand.vmem [shape: f32[32,32], index: 4, kind: input, shape index: {}]   ;;  %s4418_s5 = inlined_call_operand.vmem [shape: f32[1,32], index: 5, kind: input, shape index: {}]   ;;  %s4419_s6 = inlined_call_operand.hbm [shape: f32[16,8,32], index: 6, kind: output, shape index: {}]  }
   0x1   :  { %13 = vsyncpa [#allocation3 + $0x1], 0  ;;  %s2987_s21 = smov 0   ;;  %s2989_s22 = smov 0  }
   0x2   :  { %s2991_s23 = smov 0   ;;  %s2993_s24 = smov 0  }
   0x3 LB: > { %s3008_s25 = sadd.s32 4294967295, %s2944_s24   ;;  %s2725_s26 = sadd.s32 4294967294, %s2944_s24   ;;  %s2944_s24 = sphi %s2993_s24, %s4698_s24   ;;  %s2940_s23 = sphi %s2991_s23, %s4697_s23   ;;  %s2936_s22 = sphi %s2989_s22, %s4696_s22   ;;  %s2932_s21 = sphi %s2987_s21, %s4695_s21  }
   0x4   : > { %s3012_s27 = sadd.s32 1, %s2944_s24   ;;  %s162_s28 = sadd.s32 1, %s2940_s23 }
   0x5   : > { %s159_s29 = ssub.s32 %s2944_s24, %s3012_s27  ;;  %p172_p0 = scmp.ne.s32.totalorder %s2940_s23, %s2936_s22 }
   0x6   : > { %p160_p1 = scmp.eq.s32.totalorder %s159_s29, 0  ;;  %p173_p2 = scmp.eq.s32.totalorder %s3008_s25, 1 }
   0x7   : > { %p178_p3 = scmp.ne.s32.totalorder %s2936_s22, %s2932_s21  ;;  %p179_p4 = scmp.eq.s32.totalorder %s2725_s26, 1 }
   0x8   : > { %s3023_s30 = scalar_select %p160_p1, %s2940_s23, %s162_s28  }
   0x9   : > { %p3025_p5 = por %p173_p2, %p172_p0  ;;  %p3029_p6 = por %p179_p4, %p178_p3 }
   0xa   : > { %p2728_p7 = scmp.ge.s32.totalorder %s2944_s24, 1  ;;  %p227_p8 = scmp.lt.s32.totalorder %s2944_s24, 3 }
   0xc   : > { %p228_p9 = pnand %p2728_p7, %p227_p8 }
   0xe   : > { %231 = sbr.rel (%p228_p9) target bundleno = 1025 (0x401), region = 44 }
  0x15   : > { %v283_v0 = vld [vmem:[%s4415_s2] sm:$0xff]  ;;  %v284_v1 = vld [vmem:[%s4415_s2 + $0x8] sm:$0xff]  ;;  %v285_v2 = vld [vmem:[%s4415_s2 + $0x10] sm:$0xff]  ;;  %s2730_s15 = sshll.u32 %s3008_s25, 3  ;;  %v444_v3 = vlaneseq  ;;  %vm287_vm0 = vcmask 261120   ;;  %s2947_s12 = smov 96  }
  0x16   : > { %v2822_v4 = vpack.c.bf16 %v284_v1, %v283_v0  ;;  %v286_v5 = vld [vmem:[%s4415_s2 + $0x18] sm:$0xff]  ;;  %p263_p10 = scmp.lt.s32.totalorder %s2730_s15, 15  ;;  %vm2348_vm1 = vcmask 1041409   ;;  %vm2350_vm2 = vcmask 1042434   ;;  %vm2352_vm3 = vcmask 1043459  }
  0x17   : > { %v2826_v6 = vpack.c.bf16 %v286_v5, %v285_v2  ;;  %v3048_v7 = vshrl.u32 %v444_v3, 7  ;;  %vm2354_vm4 = vcmask 1044484   ;;  %vm2356_vm5 = vcmask 1045509  }
  0x18   : > { %2823 = vmatprep.subr.bf16.mxu0 %v2822_v4  ;;  %s4700_s15 = smov (!%p263_p10, %s2730_s15), 15  ;;  %vm2358_vm6 = vcmask 1046534   ;;  %vm2360_vm7 = vcmask 1047559  }
  0x19   : > { %2825 = vmatpush3.bf16.msra.mxu0 %v2822_v4  ;;  %s2731_s18 = sshll.u32 %s4700_s15, 3  ;;  %v3061_v8 = vsub.s32 0, %v3048_v7  ;;  %v3064_v9 = vsub.s32 1, %v3048_v7  ;;  %v3070_v12 = vsub.s32 2, %v3048_v7  ;;  %v3087_v22 = vsub.s32 3, %v3048_v7 }
  0x1a   : > { %2827 = vmatprep.subr.bf16.mxu0 %v2826_v6  ;;  %s3053_s26 = scalar_lea.vmem %s4413_s0, %s2731_s18  ;;  %s3058_s9 = scalar_lea.vmem %s4414_s1, %s2731_s18  ;;  %v3100_v28 = vsub.s32 4, %v3048_v7  ;;  %v3116_v35 = vsub.s32 5, %v3048_v7  ;;  %v3124_v40 = vsub.s32 6, %v3048_v7  ;;  %v3134_v47 = vsub.s32 7, %v3048_v7 }
  0x1b   : > { %v275_v10 = vld [vmem:[%s3053_s26] sm:$0xff]  ;;  %v276_v11 = vld [vmem:[%s3053_s26 + $0x8] sm:$0xff]  ;;  %v277_v13 = vld [vmem:[%s3053_s26 + $0x10] sm:$0xff]  ;;  %s2949_s18 = smov [#allocation2]  }
  0x1c   : > { %2790 = vmatprep.mubr.msk.f32.mxu0 %vm287_vm0, %v275_v10  ;;  %v1312_v14 = vld [vmem:[%s3058_s9] sm:$0xff]  ;;  %v3077_v17 = vld [vmem:[%s3058_s9 + $0x8] sm:$0xff]  ;;  %v278_v18 = vld [vmem:[%s3053_s26 + $0x18] sm:$0xff]  ;;  %s2886_s19 = sshll.u32 %s2949_s18, 4  ;;  %s2887_s19 = int_to_ptr.vmem [resolvable:$false] %s2886_s19 }
  0x1d   : > { %2829 = vmatpush3.bf16.msra.mxu0 %v2826_v6  ;;  %v1330_v15 = vrot.slane %v1312_v14, %v3064_v9  ;;  %v1323_v16 = vrot.slane %v1312_v14, %v3061_v8  ;;  %v1337_v19 = vrot.slane %v1312_v14, %v3070_v12  ;;  %v279_v20 = vld [vmem:[%s3053_s26 + $0x20] sm:$0xff]  ;;  %v1379_v21 = vrot.slane %v3077_v17, %v3061_v8  ;;  %v3091_v23 = vld [vmem:[%s3058_s9 + $0x28] sm:$0xff]  ;;  %v281_v26 = vld [vmem:[%s3053_s26 + $0x30] sm:$0xff]  ;;  %s2888_s20 = scalar_lea.vmem %s2887_s19, 2048 }
  0x1e   : > { %v280_v24 = vld [vmem:[%s3053_s26 + $0x28] sm:$0xff]  ;;  %v1386_v25 = vrot.slane %v3077_v17, %v3064_v9  ;;  %v1344_v27 = vrot.slane %v1312_v14, %v3087_v22  ;;  %v1610_v29 = vrot.slane %v3091_v23, %v3064_v9  ;;  %v1617_v30 = vrot.slane %v3091_v23, %v3070_v12  ;;  %v282_v31 = vld [vmem:[%s3053_s26 + $0x38] sm:$0xff]  ;;  %v1314_v37 = vld [vmem:[%s3058_s9 + $0x10] sm:$0xff]  ;;  %s2948_s26 = smov 64  }
  0x1f   : > { %1332 = vbcast.lane.b32.xlu0 %v1330_v15, 256  ;;  %1325 = vbcast.lane.b32.xlu1 %v1323_v16, 256  ;;  %v1393_v32 = vrot.slane %v3077_v17, %v3070_v12  ;;  %v1351_v33 = vrot.slane %v1312_v14, %v3100_v28  ;;  %v1400_v34 = vrot.slane %v3077_v17, %v3087_v22  ;;  %v1315_v45 = vld [vmem:[%s3058_s9 + $0x18] sm:$0xff]  ;;  %v1316_v57 = vld [vmem:[%s3058_s9 + $0x20] sm:$0xff] }
  0x20   : > { %2791 = vmatmul.mubr.msk.f32.vlgmr.msra.gmra.mrb[0].mxu0 %vm287_vm0, %v276_v11  ;;  %v1407_v36 = vrot.slane %v3077_v17, %v3100_v28  ;;  %v1358_v38 = vrot.slane %v1312_v14, %v3116_v35  ;;  %v1442_v39 = vrot.slane %v1314_v37, %v3064_v9  ;;  %v1435_v41 = vrot.slane %v1314_v37, %v3061_v8  ;;  %v3171_v11 = vld [vmem:[%s3058_s9 + $0x30] sm:$0xff] }
  0x21   : > { %2793 = vmatprep.mubr.msk.f32.mxu0 %vm287_vm0, %v277_v13  ;;  %v1365_v42 = vrot.slane %v1312_v14, %v3124_v40  ;;  %v1414_v43 = vrot.slane %v3077_v17, %v3116_v35  ;;  %v1449_v44 = vrot.slane %v1314_v37, %v3070_v12  ;;  %v1491_v46 = vrot.slane %v1315_v45, %v3061_v8 }
  0x22   : > { %v1498_v48 = vrot.slane %v1315_v45, %v3064_v9  ;;  %v1372_v49 = vrot.slane %v1312_v14, %v3134_v47  ;;  %v1421_v50 = vrot.slane %v3077_v17, %v3124_v40  ;;  %v1456_v51 = vrot.slane %v1314_v37, %v3087_v22 }
  0x23   : > { %1339 = vbcast.lane.b32.xlu0 %v1337_v19, 256  ;;  %1381 = vbcast.lane.b32.xlu1 %v1379_v21, 256  ;;  %v1505_v52 = vrot.slane %v1315_v45, %v3070_v12  ;;  %v1428_v53 = vrot.slane %v3077_v17, %v3134_v47  ;;  %v1463_v54 = vrot.slane %v1314_v37, %v3100_v28  ;;  %v3185_v19 = vld [vmem:[%s3058_s9 + $0x38] sm:$0xff]  ;;  %s259_s9 = sand.u32 1, %s2936_s22  }
  0x24   : > { %2794 = vmatmul.mubr.msk.f32.gmra.mrb[2].mxu0 %vm287_vm0, %v278_v18  ;;  %v1512_v55 = vrot.slane %v1315_v45, %v3087_v22  ;;  %v1519_v56 = vrot.slane %v1315_v45, %v3100_v28  ;;  %v1470_v58 = vrot.slane %v1314_v37, %v3116_v35  ;;  %v1554_v59 = vrot.slane %v1316_v57, %v3064_v9  ;;  %s2729_s10 = sshll.u32 %s259_s9, 6 }
  0x25   : > { %2796 = vmatprep.mubr.msk.f32.mxu0 %vm287_vm0, %v279_v20  ;;  %v1547_v60 = vrot.slane %v1316_v57, %v3061_v8  ;;  %v1477_v61 = vrot.slane %v1314_v37, %v3124_v40  ;;  %v1526_v62 = vrot.slane %v1315_v45, %v3116_v35  ;;  %v1561_v63 = vrot.slane %v1316_v57, %v3070_v12  ;;  %s261_s11 = scalar_lea.vmem [#allocation2], %s2729_s10 }
  0x26   : > { %v1603_v0 = vrot.slane %v3091_v23, %v3061_v8  ;;  %v1484_v1 = vrot.slane %v1314_v37, %v3134_v47  ;;  %v1533_v2 = vrot.slane %v1315_v45, %v3124_v40  ;;  %v1568_v3 = vrot.slane %v1316_v57, %v3087_v22  ;;  %s2651_s13 = sshll.u32 %s261_s11, 4  ;;  %s4368_s13 = int_to_ptr.vmem [resolvable:$true] %s2651_s13 }
  0x27   : > { %1388 = vbcast.lane.b32.xlu0 %v1386_v25, 256  ;;  %1346 = vbcast.lane.b32.xlu1 %v1344_v27, 256  ;;  %v1540_v4 = vrot.slane %v1315_v45, %v3134_v47  ;;  %v1575_v5 = vrot.slane %v1316_v57, %v3100_v28  ;;  %v1624_v6 = vrot.slane %v3091_v23, %v3087_v22  ;;  %s2882_s17 = scalar_lea.vmem %s4368_s13, 1024  ;;  %p2889_p0 = scmp.lt.s32.totalorder %s4368_s13, %s2887_s19 }
  0x28   : > { %2797 = vmatmul.mubr.msk.f32.gmra.mrb[4].mxu0 %vm287_vm0, %v280_v24  ;;  %v1582_v10 = vrot.slane %v1316_v57, %v3116_v35  ;;  %v1631_v13 = vrot.slane %v3091_v23, %v3100_v28  ;;  %v1659_v14 = vrot.slane %v3171_v11, %v3061_v8  ;;  %v1666_v15 = vrot.slane %v3171_v11, %v3064_v9  ;;  %p2883_p11 = scmp.ne.s32.totalorder %s4368_s13, %s2882_s17  ;;  %p2890_p1 = scmp.lt.s32.totalorder %s2888_s20, %s2882_s17 }
  0x29   : > { %2799 = vmatprep.mubr.msk.f32.mxu0 %vm287_vm0, %v281_v26  ;;  %v1589_v16 = vrot.slane %v1316_v57, %v3124_v40  ;;  %v1638_v17 = vrot.slane %v3091_v23, %v3116_v35  ;;  %v1673_v18 = vrot.slane %v3171_v11, %v3070_v12  ;;  %v1715_v20 = vrot.slane %v3185_v19, %v3061_v8 }
  0x2a   : > { %v1722_v21 = vrot.slane %v3185_v19, %v3064_v9  ;;  %v1596_v24 = vrot.slane %v1316_v57, %v3134_v47  ;;  %v1645_v25 = vrot.slane %v3091_v23, %v3124_v40  ;;  %v1680_v26 = vrot.slane %v3171_v11, %v3087_v22  ;;  %p2884_p12 = pnand %p2883_p11, %p3025_p5  ;;  %p2891_p2 = por %p2890_p1, %p2889_p0 }
  0x2b   : > { %1395 = vbcast.lane.b32.xlu0 %v1393_v32, 256  ;;  %1353 = vbcast.lane.b32.xlu1 %v1351_v33, 256  ;;  %v1729_v27 = vrot.slane %v3185_v19, %v3070_v12  ;;  %v1687_v9 = vrot.slane %v3171_v11, %v3100_v28 }
  0x2c   : > { %2800 = vmatmul.mubr.msk.f32.gmra.mrb[6].mxu0 %vm287_vm0, %v282_v31  ;;  %p2885_p13 = pneg %p2884_p12 }
  0x2e   : > { %p2892_p3 = pnand %p2891_p2, %p2885_p13 }
  0x2f   : > { %1402 = vbcast.lane.b32.xlu0 %v1400_v34, 256  ;;  %1409 = vbcast.lane.b32.xlu1 %v1407_v36, 256 }
  0x33   : > { %1360 = vbcast.lane.b32.xlu0 %v1358_v38, 256  ;;  %1444 = vbcast.lane.b32.xlu1 %v1442_v39, 256 }
  0x37   : > { %1437 = vbcast.lane.b32.xlu0 %v1435_v41, 256  ;;  %1367 = vbcast.lane.b32.xlu1 %v1365_v42, 256 }
  0x3b   : > { %1416 = vbcast.lane.b32.xlu0 %v1414_v43, 256  ;;  %1451 = vbcast.lane.b32.xlu1 %v1449_v44, 256 }
  0x3f   : > { %1493 = vbcast.lane.b32.xlu0 %v1491_v46, 256  ;;  %1500 = vbcast.lane.b32.xlu1 %v1498_v48, 256  ;;  %v2946_v48 = vmov 1966171168  }
  0x43   : > { %1374 = vbcast.lane.b32.xlu0 %v1372_v49, 256  ;;  %1423 = vbcast.lane.b32.xlu1 %v1421_v50, 256  ;;  %v442_v49 = vunpack.c.l.s4 %v2946_v48 }
  0x47   : > { %1458 = vbcast.lane.b32.xlu0 %v1456_v51, 256  ;;  %1507 = vbcast.lane.b32.xlu1 %v1505_v52, 256  ;;  %v443_v51 = vunpack.c.0.s8 %v442_v49 }
  0x4b   : > { %1430 = vbcast.lane.b32.xlu0 %v1428_v53, 256  ;;  %1465 = vbcast.lane.b32.xlu1 %v1463_v54, 256  ;;  %v2742_v53 = vld [vmem:[%s4416_s3] ss:$0 sm:$0xff]  ;;  %v3244_v54 = vsub.s32 %v443_v51, %v3048_v7 }
  0x4f   : > { %1514 = vbcast.lane.b32.xlu0 %v1512_v55, 256  ;;  %1521 = vbcast.lane.b32.xlu1 %v1519_v56, 256 }
  0x53   : > { %1472 = vbcast.lane.b32.xlu0 %v1470_v58, 256  ;;  %1556 = vbcast.lane.b32.xlu1 %v1554_v59, 256 }
  0x57   : > { %1549 = vbcast.lane.b32.xlu0 %v1547_v60, 256  ;;  %1479 = vbcast.lane.b32.xlu1 %v1477_v61, 256 }
  0x5b   : > { %1528 = vbcast.lane.b32.xlu0 %v1526_v62, 256  ;;  %1563 = vbcast.lane.b32.xlu1 %v1561_v63, 256 }
  0x5f   : > { %1605 = vbcast.lane.b32.xlu0 %v1603_v0, 256  ;;  %1612 = vbcast.lane.b32.xlu1 %v1610_v29, 256  ;;  %v1652_v29 = vrot.slane %v3091_v23, %v3134_v47 }
  0x63   : > { %1486 = vbcast.lane.b32.xlu0 %v1484_v1, 256  ;;  %1535 = vbcast.lane.b32.xlu1 %v1533_v2, 256 }
  0x67   : > { %1570 = vbcast.lane.b32.xlu0 %v1568_v3, 256  ;;  %1619 = vbcast.lane.b32.xlu1 %v1617_v30, 256  ;;  %v1694_v30 = vrot.slane %v3171_v11, %v3116_v35 }
  0x6b   : > { %1542 = vbcast.lane.b32.xlu0 %v1540_v4, 256  ;;  %1577 = vbcast.lane.b32.xlu1 %v1575_v5, 256  ;;  %v1736_v5 = vrot.slane %v3185_v19, %v3087_v22 }
  0x6f   : > { %1626 = vbcast.lane.b32.xlu0 %v1624_v6, 256  ;;  %1584 = vbcast.lane.b32.xlu1 %v1582_v10, 256 }
  0x73   : > { %1633 = vbcast.lane.b32.xlu0 %v1631_v13, 256  ;;  %1661 = vbcast.lane.b32.xlu1 %v1659_v14, 256 }
  0x77   : > { %1668 = vbcast.lane.b32.xlu0 %v1666_v15, 256  ;;  %1591 = vbcast.lane.b32.xlu1 %v1589_v16, 256 }
  0x7b   : > { %1640 = vbcast.lane.b32.xlu0 %v1638_v17, 256  ;;  %1675 = vbcast.lane.b32.xlu1 %v1673_v18, 256 }
  0x7f   : > { %1717 = vbcast.lane.b32.xlu0 %v1715_v20, 256  ;;  %1724 = vbcast.lane.b32.xlu1 %v1722_v21, 256 }
  0x83   : > { %1598 = vbcast.lane.b32.xlu0 %v1596_v24, 256  ;;  %1647 = vbcast.lane.b32.xlu1 %v1645_v25, 256 }
  0x87   : > { %1682 = vbcast.lane.b32.xlu0 %v1680_v26, 256  ;;  %1731 = vbcast.lane.b32.xlu1 %v1729_v27, 256 }
  0x8b   : > { %1654 = vbcast.lane.b32.xlu0 %v1652_v29, 256  ;;  %1689 = vbcast.lane.b32.xlu1 %v1687_v9, 256 }
  0x8f   : > { %1696 = vbcast.lane.b32.xlu1 %v1694_v30, 256 }
  0x91   : > { %v3204_v31 = vpop.permute.xlu1 %1325  ;;  %v3206_v32 = vpop.permute.xlu0 %1332 }
  0x95   : > { %v3208_v33 = vpop.permute.xlu1 %1381  ;;  %v3210_v12 = vpop.permute.xlu0 %1339 }
  0x99   : > { %v3212_v34 = vpop.permute.xlu1 %1346  ;;  %v3214_v23 = vpop.permute.xlu0 %1388 }
  0x9a   : > { %4451 = vst [vmem:[#allocation5_spill] sm:$0xff] %v3212_v34 }
  0x9d   : > { %v3216_v36 = vpop.permute.xlu1 %1353  ;;  %v3218_v37 = vpop.permute.xlu0 %1395 }
  0x9e   : > { %4452 = vst [vmem:[#allocation6_spill] sm:$0xff] %v3216_v36 }
  0xa1   : > { %v3220_v38 = vpop.permute.xlu1 %1409  ;;  %v3222_v39 = vpop.permute.xlu0 %1402 }
  0xa2   : > { %4453 = vst [vmem:[#allocation7_spill] sm:$0xff] %v3220_v38 }
  0xa5   : > { %v3224_v41 = vpop.permute.xlu1 %1444  ;;  %v3226_v42 = vpop.permute.xlu0 %1360 }
  0xa6   : > { %4454 = vst [vmem:[#allocation8_spill] sm:$0xff] %v3226_v42 }
  0xa9   : > { %v3228_v43 = vpop.permute.xlu1 %1367  ;;  %v3230_v44 = vpop.permute.xlu0 %1437 }
  0xaa   : > { %4455 = vst [vmem:[#allocation9_spill] sm:$0xff] %v3228_v43 }
  0xad   : > { %v3232_v45 = vpop.permute.xlu1 %1451  ;;  %v3234_v46 = vpop.permute.xlu0 %1416 }
  0xae   : > { %4456 = vst [vmem:[#allocation10_spill] sm:$0xff] %v3232_v45  ;;  %4457 = vst [vmem:[#allocation11_spill] sm:$0xff] %v3234_v46 }
  0xb1   : > { %v3236_v50 = vpop.permute.xlu1 %1500  ;;  %v3238_v52 = vpop.permute.xlu0 %1493 }
  0xb5   : > { %v3248_v56 = vpop.permute.xlu1 %1423  ;;  %v3255_v59 = vpop.permute.xlu0 %1374 }
  0xb6   : > { %4459 = vst [vmem:[#allocation13_spill] sm:$0xff] %v3248_v56  ;;  %4461 = vst [vmem:[#allocation15_spill] sm:$0xff] %v3255_v59 }
  0xb9   : > { %v3278_v14 = vpop.permute.xlu1 %1507  ;;  %v3286_v18 = vpop.permute.xlu0 %1458 }
  0xba   : > { %4464 = vst [vmem:[#allocation18_spill] sm:$0xff] %v3278_v14  ;;  %4465 = vst [vmem:[#allocation19_spill] sm:$0xff] %v3286_v18 }
  0xbd   : > { %v3310_v48 = vpop.permute.xlu1 %1465  ;;  %v3316_v51 = vpop.permute.xlu0 %1430 }
  0xbe   : > { %4470 = vst [vmem:[#allocation24_spill] sm:$0xff] %v3310_v48  ;;  %4472 = vst [vmem:[#allocation26_spill] sm:$0xff] %v3316_v51 }
  0xf3   : > { %v3246_v55 = vpop.f32.mrb[0].mxu0 }
  0xf4   : > { %4458 = vst [vmem:[#allocation12_spill] sm:$0xff] %v3246_v55  ;;  %v425_v57 = vadd.f32 %v3246_v55, %v2742_v53  ;;  %1162 = vrot.lane.b32.xlu0 %v3246_v55, %s2947_s12  ;;  %v3253_v58 = vpop.f32.mrb[1].mxu0 }
  0xf5   : > { %4460 = vst [vmem:[#allocation14_spill] sm:$0xff] %v3253_v58  ;;  %v424_v60 = vadd.f32 %v2742_v53, %v3253_v58 }
  0xf6   : > { %v489_v61 = vcombine.high %v425_v57, %v425_v57  ;;  %v496_v7 = vrot.slane %v425_v57, %v3244_v54  ;;  %v1743_v57 = vrot.slane %v3185_v19, %v3100_v28 }
  0xf7   : > { %v440_v62 = vcombine.high %v424_v60, %v424_v60  ;;  %v447_v63 = vrot.slane %v424_v60, %v3244_v54  ;;  %v3260_v0 = vpop.f32.mrb[2].mxu0 }
  0xf8   : > { %4462 = vst [vmem:[#allocation16_spill] sm:$0xff] %v3260_v0  ;;  %v503_v1 = vrot.slane %v489_v61, %v3244_v54  ;;  %v504_v2 = vcombine.high %v496_v7, %v496_v7  ;;  %v3264_v3 = vrot.slane %v496_v7, %v3244_v54  ;;  %1160 = vrot.lane.b32.xlu0 %v3253_v58, %s2947_s12  ;;  %v3268_v4 = vpop.f32.mrb[3].mxu0 }
  0xf9   : > { %4463 = vst [vmem:[#allocation17_spill] sm:$0xff] %v3268_v4  ;;  %v454_v6 = vrot.slane %v440_v62, %v3244_v54  ;;  %v455_v10 = vcombine.high %v447_v63, %v447_v63  ;;  %v3274_v13 = vrot.slane %v447_v63, %v3244_v54  ;;  %1166 = vrot.lane.b32.xlu1 %v3260_v0, %s2947_s12 }
  0xfa   : > { %v505_v15 = vcombine.high %v503_v1, %v503_v1  ;;  %v3281_v16 = vrot.slane %v503_v1, %v3244_v54  ;;  %v3284_v17 = vrot.slane %v504_v2, %v3244_v54  ;;  %v427_v29 = vadd.f32 %v3260_v0, %v2742_v53 }
  0xfb   : > { %v456_v22 = vcombine.high %v454_v6, %v454_v6  ;;  %v3289_v20 = vrot.slane %v454_v6, %v3244_v54  ;;  %v3292_v21 = vrot.slane %v455_v10, %v3244_v54  ;;  %v3294_v24 = vpop.f32.mrb[4].mxu0  ;;  %v426_v9 = vadd.f32 %v2742_v53, %v3268_v4 }
  0xfc   : > { %4466 = vst [vmem:[#allocation20_spill] sm:$0xff] %v3294_v24  ;;  %v3297_v25 = vrot.slane %v505_v15, %v3244_v54  ;;  %1738 = vbcast.lane.b32.xlu0 %v1736_v5, 256  ;;  %v3299_v26 = vpop.f32.mrb[5].mxu0  ;;  %v587_v60 = vcombine.high %v427_v29, %v427_v29  ;;  %v594_v61 = vrot.slane %v427_v29, %v3244_v54 }
  0xfd   : > { %4467 = vst [vmem:[#allocation21_spill] sm:$0xff] %v3299_v26  ;;  %v3302_v27 = vrot.slane %v456_v22, %v3244_v54  ;;  %1164 = vrot.lane.b32.xlu1 %v3268_v4, %s2947_s12  ;;  %v538_v7 = vcombine.high %v426_v9, %v426_v9  ;;  %v545_v62 = vrot.slane %v426_v9, %v3244_v54 }
  0xfe   : > { %v429_v63 = vadd.f32 %v3294_v24, %v2742_v53  ;;  %v428_v1 = vadd.f32 %v2742_v53, %v3299_v26  ;;  %v601_v6 = vrot.slane %v587_v60, %v3244_v54  ;;  %v602_v10 = vcombine.high %v594_v61, %v594_v61  ;;  %v3343_v60 = vpop.permute.xlu1 %1521 }
  0xff   : > { %4468 = vst [vmem:[#allocation22_spill] sm:$0xff] %v3302_v27  ;;  %v3308_v30 = vpop.f32.mrb[6].mxu0  ;;  %v3330_v15 = vrot.slane %v594_v61, %v3244_v54  ;;  %v552_v28 = vrot.slane %v538_v7, %v3244_v54  ;;  %v553_v22 = vcombine.high %v545_v62, %v545_v62  ;;  %v3336_v29 = vrot.slane %v545_v62, %v3244_v54 }
 0x100   : > { %4469 = vst [vmem:[#allocation23_spill] sm:$0xff] %v3308_v30  ;;  %1170 = vrot.lane.b32.xlu0 %v3294_v24, %s2947_s12  ;;  %v3314_v49 = vpop.f32.mrb[7].mxu0  ;;  %v431_v2 = vadd.f32 %v3308_v30, %v2742_v53  ;;  %v692_v9 = vrot.slane %v429_v63, %v3244_v54  ;;  %4473 = vst [vmem:[#allocation27_spill] sm:$0xff] %v3343_v60  ;;  %v603_v61 = vcombine.high %v601_v6, %v601_v6 }
 0x101   : > { %4471 = vst [vmem:[#allocation25_spill] sm:$0xff] %v3314_v49  ;;  %1168 = vrot.lane.b32.xlu1 %v3299_v26, %s2947_s12  ;;  %v430_v5 = vadd.f32 %v2742_v53, %v3314_v49  ;;  %v1701_v53 = vrot.slane %v3171_v11, %v3124_v40  ;;  %v3346_v7 = vrot.slane %v601_v6, %v3244_v54  ;;  %v3351_v26 = vpop.permute.xlu0 %1514 }
 0x102   : > { %4474 = vst [vmem:[#allocation28_spill] sm:$0xff] %v3351_v26  ;;  %v554_v62 = vcombine.high %v552_v28, %v552_v28  ;;  %v3354_v24 = vrot.slane %v552_v28, %v3244_v54  ;;  %v3360_v4 = vrot.slane %v603_v61, %v3244_v54  ;;  %v1750_v6 = vrot.slane %v3185_v19, %v3116_v35  ;;  %v3369_v28 = vpop.permute.xlu1 %1556 }
 0x103   : > { %v685_v58 = vcombine.high %v429_v63, %v429_v63  ;;  %4476 = vst [vmem:[#allocation30_spill] sm:$0xff] %v3369_v28  ;;  %v1764_v35 = vrot.slane %v3185_v19, %v3134_v47  ;;  %v643_v63 = vrot.slane %v428_v1, %v3244_v54  ;;  %v783_v60 = vcombine.high %v431_v2, %v431_v2 }
 0x104   : > { %1174 = vrot.lane.b32.xlu0 %v3308_v30, %s2947_s12  ;;  %v3349_v30 = vrot.slane %v602_v10, %v3244_v54  ;;  %v3365_v0 = vrot.slane %v554_v62, %v3244_v54  ;;  %v1708_v10 = vrot.slane %v3171_v11, %v3134_v47  ;;  %v700_v62 = vcombine.high %v692_v9, %v692_v9 }
 0x105   : > { %1172 = vrot.lane.b32.xlu1 %v3314_v49, %s2947_s12  ;;  %v3357_v49 = vrot.slane %v553_v22, %v3244_v54  ;;  %v1757_v22 = vrot.slane %v3185_v19, %v3124_v40  ;;  %v3373_v61 = vpop.permute.xlu0 %1472  ;;  %v636_v11 = vcombine.high %v428_v1, %v428_v1  ;;  %v651_v19 = vcombine.high %v643_v63, %v643_v63  ;;  %s2757_s12 = sshll.u32 %s3008_s25, 10  ;;  %s4372_s25 = scalar_lea.sflag [#allocation3], %s259_s9 }
 0x106   : > { %4475 = vst [vmem:[#allocation29_spill] sm:$0xff] %v3365_v0  ;;  %4477 = vst [vmem:[#allocation31_spill] sm:$0xff] %v3373_v61  ;;  %v633_v18 = vcombine.high %v3346_v7, %v3346_v7  ;;  %s4366_s16 = scalar_lea.hbm %s4419_s6, %s2757_s12 }
 0x107   : > { %v650_v47 = vrot.slane %v636_v11, %v3244_v54 }
 0x108   : > { %1745 = vbcast.lane.b32.xlu0 %v1743_v57, 256  ;;  %v699_v57 = vrot.slane %v685_v58, %v3244_v54  ;;  %v3391_v58 = vrot.slane %v643_v63, %v3244_v54  ;;  %v734_v63 = vcombine.high %v430_v5, %v430_v5 }
 0x109   : > { %1703 = vbcast.lane.b32.xlu1 %v1701_v53, 256  ;;  %v3379_v53 = vrot.slane %v692_v9, %v3244_v54  ;;  %v3393_v9 = vpop.permute.xlu1 %1479  ;;  %v3398_v61 = vpop.permute.xlu0 %1549 }
 0x10a   : > { %v701_v55 = vcombine.high %v699_v57, %v699_v57  ;;  %v3384_v40 = vrot.slane %v699_v57, %v3244_v54  ;;  %4479 = vst [vmem:[#allocation33_spill] sm:$0xff] %v3393_v9  ;;  %4481 = vst [vmem:[#allocation35_spill] sm:$0xff] %v3398_v61  ;;  %v652_v57 = vcombine.high %v650_v47, %v650_v47 }
 0x10b   : > { %v748_v51 = vrot.slane %v734_v63, %v3244_v54  ;;  %v2281_v63 = vld [vmem:[%s4417_s4 + $0x8] sm:$0xff] }
 0x10c   : > { %1752 = vbcast.lane.b32.xlu0 %v1750_v6, 256  ;;  %v790_v6 = vrot.slane %v431_v2, %v3244_v54  ;;  %4478 = vst [vmem:[#allocation32_spill] sm:$0xff] %v3384_v40  ;;  %v3396_v1 = vrot.slane %v701_v55, %v3244_v54  ;;  %v3407_v11 = vrot.slane %v652_v57, %v3244_v54 }
 0x10d   : > { %1710 = vbcast.lane.b32.xlu1 %v1708_v10, 256  ;;  %v3387_v10 = vrot.slane %v700_v62, %v3244_v54  ;;  %v3401_v62 = vrot.slane %v650_v47, %v3244_v54  ;;  %v3410_v9 = vpop.permute.xlu1 %1563  ;;  %v3415_v48 = vpop.permute.xlu0 %1528  ;;  %v741_v47 = vrot.slane %v430_v5, %v3244_v54  ;;  %v2280_v5 = vld [vmem:[%s4417_s4] sm:$0xff] }
 0x10e   : > { %4480 = vst [vmem:[#allocation34_spill] sm:$0xff] %v3396_v1  ;;  %4482 = vst [vmem:[#allocation36_spill] sm:$0xff] %v3407_v11  ;;  %v798_v55 = vcombine.high %v790_v6, %v790_v6  ;;  %v3413_v2 = vrot.slane %v790_v6, %v3244_v54  ;;  %v3429_v6 = vrot.slane %v748_v51, %v3244_v54 }
 0x10f   : > { %4483 = vst [vmem:[#allocation37_spill] sm:$0xff] %v3410_v9  ;;  %4484 = vst [vmem:[#allocation38_spill] sm:$0xff] %v3415_v48  ;;  %v749_v56 = vcombine.high %v741_v47, %v741_v47  ;;  %v3426_v46 = vrot.slane %v741_v47, %v3244_v54  ;;  %v2282_v47 = vld [vmem:[%s4417_s4 + $0x10] sm:$0xff]  ;;  %v2830_v59 = vpack.c.bf16 %v2281_v63, %v2280_v5 }
 0x110   : > { %1759 = vbcast.lane.b32.xlu0 %v1757_v22, 256  ;;  %v3404_v22 = vrot.slane %v651_v19, %v3244_v54  ;;  %v3420_v19 = vrot.slane %v798_v55, %v3244_v54  ;;  %4487 = vst [vmem:[#allocation41_spill] sm:$0xff] %v3429_v6 }
 0x111   : > { %1766 = vbcast.lane.b32.xlu1 %v1764_v35, 256  ;;  %v797_v35 = vrot.slane %v783_v60, %v3244_v54  ;;  %v750_v60 = vcombine.high %v748_v51, %v748_v51  ;;  %4486 = vst [vmem:[#allocation40_spill] sm:$0xff] %v3426_v46  ;;  %v3438_v55 = vrot.slane %v749_v56, %v3244_v54  ;;  %v3440_v48 = vpop.permute.xlu1 %1612  ;;  %v2283_v51 = vld [vmem:[%s4417_s4 + $0x18] sm:$0xff]  ;;  %v3448_v38 = vpop.permute.xlu0 %1605 }
 0x112   : > { %4488 = vst [vmem:[#allocation42_spill] sm:$0xff] %v3440_v48  ;;  %4489 = vst [vmem:[#allocation43_spill] sm:$0xff] %v3448_v38  ;;  %2831 = vmatprep.subr.bf16.mxu1 %v2830_v59  ;;  %v2834_v36 = vpack.c.bf16 %v2283_v51, %v2282_v47  ;;  %v583_v38 = vcombine.high %v3336_v29, %v3336_v29  ;;  %v584_v48 = vcombine.high %v3354_v24, %v3354_v24 }
 0x113   : > { %v3423_v57 = vrot.slane %v797_v35, %v3244_v54  ;;  %v799_v43 = vcombine.high %v797_v35, %v797_v35  ;;  %v3451_v42 = vrot.slane %v750_v60, %v3244_v54  ;;  %2833 = vmatpush3.bf16.msra.mxu1 %v2830_v59 }
 0x114   : > { %2835 = vmatprep.subr.bf16.mxu1 %v2834_v36 }
 0x115   : > { %4485 = vst [vmem:[#allocation39_spill] sm:$0xff] %v3423_v57  ;;  %v3454_v56 = vrot.slane %v799_v43, %v3244_v54  ;;  %v3456_v34 = vpop.permute.xlu1 %1535  ;;  %v3458_v9 = vpop.permute.xlu0 %1486 }
 0x116   : > { %4490 = vst [vmem:[#allocation44_spill] sm:$0xff] %v3456_v34  ;;  %4491 = vst [vmem:[#allocation45_spill] sm:$0xff] %v3458_v9  ;;  %v487_v9 = vcombine.high %v3292_v21, %v3292_v21 }
 0x117   : > { %2837 = vmatpush3.bf16.msra.mxu1 %v2834_v36 }
 0x119   : > { %v3460_v28 = vpop.permute.xlu1 %1619  ;;  %v3462_v61 = vpop.permute.xlu0 %1570 }
 0x11a   : > { %4492 = vst [vmem:[#allocation46_spill] sm:$0xff] %v3460_v28  ;;  %4493 = vst [vmem:[#allocation47_spill] sm:$0xff] %v3462_v61  ;;  %v488_v61 = vcombine.high %v3302_v27, %v3302_v27  ;;  %v3544_v28 = vrot.slane %v487_v9, %v3061_v8  ;;  %v585_v9 = vcombine.high %v3357_v49, %v3357_v49 }
 0x11b   : > { %v3595_v27 = vrot.slane %v583_v38, %v3061_v8  ;;  %v733_v38 = vcombine.high %v3396_v1, %v3396_v1 }
 0x11d   : > { %v3464_v35 = vpop.permute.xlu1 %1577  ;;  %v3466_v60 = vpop.permute.xlu0 %1542 }
 0x11e   : > { %4494 = vst [vmem:[#allocation48_spill] sm:$0xff] %v3464_v35  ;;  %4495 = vst [vmem:[#allocation49_spill] sm:$0xff] %v3466_v60  ;;  %v535_v60 = vcombine.high %v3281_v16, %v3281_v16 }
 0x121   : > { %v3468_v5 = vpop.permute.xlu1 %1584  ;;  %v3470_v43 = vpop.permute.xlu0 %1626 }
 0x122   : > { %4496 = vst [vmem:[#allocation50_spill] sm:$0xff] %v3468_v5  ;;  %4497 = vst [vmem:[#allocation51_spill] sm:$0xff] %v3470_v43  ;;  %v534_v5 = vcombine.high %v3264_v3, %v3264_v3 }
 0x125   : > { %v3472_v54 = vpop.permute.xlu1 %1661  ;;  %v3474_v59 = vpop.permute.xlu0 %1633 }
 0x126   : > { %4498 = vst [vmem:[#allocation52_spill] sm:$0xff] %v3472_v54  ;;  %4499 = vst [vmem:[#allocation53_spill] sm:$0xff] %v3474_v59  ;;  %v536_v59 = vcombine.high %v3284_v17, %v3284_v17  ;;  %v3505_v54 = vrot.slane %v534_v5, %v3061_v8  ;;  %v3521_v5 = vrot.slane %v535_v60, %v3061_v8 }
 0x127   : > { %v3554_v60 = vrot.slane %v488_v61, %v3061_v8  ;;  %v681_v61 = vcombine.high %v3391_v58, %v3391_v58 }
 0x129   : > { %v3476_v63 = vpop.permute.xlu1 %1591  ;;  %v3478_v47 = vpop.permute.xlu0 %1668  ;;  %4509 = vst [vmem:[#allocation63_spill] sm:$0xff] %v3554_v60  ;;  %v3657_v1 = vrot.slane %v681_v61, %v3061_v8 }
 0x12a   : > { %4500 = vst [vmem:[#allocation54_spill] sm:$0xff] %v3476_v63  ;;  %4501 = vst [vmem:[#allocation55_spill] sm:$0xff] %v3478_v47  ;;  %v537_v63 = vcombine.high %v3297_v25, %v3297_v25 }
 0x12c   : > { %v3526_v43 = vrot.slane %v537_v63, %v3061_v8  ;;  %v634_v63 = vcombine.high %v3349_v30, %v3349_v30 }
 0x12d   : > { %v3480_v36 = vpop.permute.xlu1 %1675  ;;  %v3482_v51 = vpop.permute.xlu0 %1640 }
 0x12e   : > { %4502 = vst [vmem:[#allocation56_spill] sm:$0xff] %v3480_v36  ;;  %4503 = vst [vmem:[#allocation57_spill] sm:$0xff] %v3482_v51  ;;  %v485_v36 = vcombine.high %v3274_v13, %v3274_v13  ;;  %v3516_v51 = vrot.slane %v536_v59, %v3061_v8  ;;  %v632_v59 = vcombine.high %v3330_v15, %v3330_v15 }
 0x131   : > { %v3484_v34 = vpop.permute.xlu1 %1724  ;;  %v3486_v35 = vpop.permute.xlu0 %1717 }
 0x132   : > { %4504 = vst [vmem:[#allocation58_spill] sm:$0xff] %v3484_v34  ;;  %4505 = vst [vmem:[#allocation59_spill] sm:$0xff] %v3486_v35  ;;  %v486_v34 = vcombine.high %v3289_v20, %v3289_v20 }
 0x134   : > { %v3549_v45 = vrot.slane %v486_v34, %v3061_v8 }
 0x135   : > { %v3502_v47 = vpop.permute.xlu1 %1647  ;;  %v3513_v35 = vpop.permute.xlu0 %1598 }
 0x136   : > { %4506 = vst [vmem:[#allocation60_spill] sm:$0xff] %v3502_v47  ;;  %4507 = vst [vmem:[#allocation61_spill] sm:$0xff] %v3513_v35  ;;  %v3535_v47 = vrot.slane %v485_v36, %v3061_v8  ;;  %v635_v36 = vcombine.high %v3360_v4, %v3360_v4  ;;  %v3567_v35 = vrot.slane %v632_v59, %v3061_v8 }
 0x137   : > { %4508 = vst [vmem:[#allocation62_spill] sm:$0xff] %v3549_v45  ;;  %v3576_v45 = vrot.slane %v634_v63, %v3061_v8  ;;  %v586_v59 = vcombine.high %v3365_v0, %v3365_v0  ;;  %v730_v63 = vcombine.high %v3379_v53, %v3379_v53  ;;  %v828_v0 = vcombine.high %v3413_v2, %v3413_v2 }
 0x138   : > { %v3586_v34 = vrot.slane %v635_v36, %v3061_v8  ;;  %v732_v36 = vcombine.high %v3387_v10, %v3387_v10 }
 0x139   : > { %v3562_v26 = vpop.permute.xlu1 %1731  ;;  %v3573_v60 = vpop.permute.xlu0 %1682 }
 0x13a   : > { %4510 = vst [vmem:[#allocation64_spill] sm:$0xff] %v3562_v26  ;;  %4511 = vst [vmem:[#allocation65_spill] sm:$0xff] %v3573_v60  ;;  %v3581_v26 = vrot.slane %v633_v18, %v3061_v8  ;;  %v3598_v18 = vrot.slane %v585_v9, %v3061_v8  ;;  %v3607_v60 = vrot.slane %v584_v48, %v3061_v8 }
 0x13b   : > { %4513 = vst [vmem:[#allocation67_spill] sm:$0xff] %v3586_v34  ;;  %v731_v34 = vcombine.high %v3384_v40, %v3384_v40  ;;  %v3614_v9 = vrot.slane %v586_v59, %v3061_v8  ;;  %v682_v59 = vcombine.high %v3401_v62, %v3401_v62  ;;  %v3636_v14 = vrot.slane %v732_v36, %v3061_v8 }
 0x13c   : > { %4512 = vst [vmem:[#allocation66_spill] sm:$0xff] %v3581_v26  ;;  %4514 = vst [vmem:[#allocation68_spill] sm:$0xff] %v3607_v60  ;;  %v3625_v60 = vrot.slane %v730_v63, %v3061_v8  ;;  %v683_v26 = vcombine.high %v3404_v22, %v3404_v22  ;;  %v684_v63 = vcombine.high %v3407_v11, %v3407_v11 }
 0x13d   : > { %4515 = vst [vmem:[#allocation69_spill] sm:$0xff] %v3614_v9  ;;  %v3622_v48 = vpop.permute.xlu1 %1689  ;;  %v3633_v9 = vpop.permute.xlu0 %1654  ;;  %4519 = vst [vmem:[#allocation73_spill] sm:$0xff] %v3636_v14  ;;  %v3645_v40 = vrot.slane %v731_v34, %v3061_v8  ;;  %v830_v34 = vcombine.high %v3420_v19, %v3420_v19  ;;  %v779_v36 = vcombine.high %v3426_v46, %v3426_v46 }
 0x13e   : > { %4516 = vst [vmem:[#allocation70_spill] sm:$0xff] %v3622_v48  ;;  %4517 = vst [vmem:[#allocation71_spill] sm:$0xff] %v3625_v60  ;;  %v3648_v60 = vrot.slane %v733_v38, %v3061_v8  ;;  %v3664_v38 = vrot.slane %v683_v26, %v3061_v8  ;;  %v780_v48 = vcombine.high %v3429_v6, %v3429_v6 }
 0x13f   : > { %4518 = vst [vmem:[#allocation72_spill] sm:$0xff] %v3633_v9  ;;  %4520 = vst [vmem:[#allocation74_spill] sm:$0xff] %v3645_v40  ;;  %v3667_v9 = vrot.slane %v682_v59, %v3061_v8  ;;  %v3674_v61 = vrot.slane %v684_v63, %v3061_v8  ;;  %v3681_v26 = vrot.slane %v828_v0, %v3061_v8 }
 0x140   : > { %4521 = vst [vmem:[#allocation75_spill] sm:$0xff] %v3648_v60  ;;  %v781_v40 = vcombine.high %v3438_v55, %v3438_v55  ;;  %v3694_v60 = vrot.slane %v830_v34, %v3061_v8  ;;  %v3705_v63 = vrot.slane %v779_v36, %v3061_v8  ;;  %v3708_v6 = vrot.slane %v780_v48, %v3061_v8 }
 0x141   : > { %4522 = vst [vmem:[#allocation76_spill] sm:$0xff] %v3667_v9  ;;  %4523 = vst [vmem:[#allocation77_spill] sm:$0xff] %v3674_v61  ;;  %v3683_v59 = vpop.permute.xlu1 %1696  ;;  %v4526_v9 = vrot.slane %v3284_v17, %v3061_v8  ;;  %v782_v34 = vcombine.high %v3451_v42, %v3451_v42  ;;  %v829_v14 = vcombine.high %v3423_v57, %v3423_v57 }
 0x142   : > { %4524 = vst [vmem:[#allocation78_spill] sm:$0xff] %v3683_v59  ;;  %v4525_v59 = vrot.slane %v3264_v3, %v3061_v8  ;;  %4527 = vst [vmem:[#allocation79_spill] sm:$0xff] %v3705_v63  ;;  %v831_v17 = vcombine.high %v3454_v56, %v3454_v56 }
 0x143   : > { %4528 = vst [vmem:[#allocation80_spill] sm:$0xff] %v3708_v6  ;;  %v3742_v6 = vrot.slane %v782_v34, %v3061_v8  ;;  %v3745_v57 = vrot.slane %v829_v14, %v3061_v8 }
 0x144   : > { %v3762_v14 = vrot.slane %v831_v17, %v3061_v8  ;;  %v4538_v17 = vrot.slane %v3349_v30, %v3061_v8 }
 0x146   : > { %4536 = vst [vmem:[#allocation84_spill] sm:$0xff] %v3762_v14  ;;  %v4540_v14 = vrot.slane %v3336_v29, %v3061_v8 }
 0x166   : > { %v1163_v61 = vpop.permute.xlu0 %1162 }
 0x167   : > { %v1192_v11 = vadd.f32 %v1163_v61, %v4525_v59  ;;  %v1193_v46 = vadd.f32 %v1163_v61, %v4526_v9  ;;  %v1194_v0 = vadd.f32 %v1163_v61, %v3505_v54  ;;  %v3718_v9 = vrot.slane %v781_v40, %v3061_v8 }
 0x168   : > { %v1195_v36 = vadd.f32 %v1163_v61, %v3516_v51  ;;  %v4532_v54 = vrot.slane %v3297_v25, %v3061_v8 }
 0x169   : > { %v1256_v3 = vmax.f32 %v1192_v11, 0.0  ;;  %v1257_v59 = vmax.f32 %v1193_v46, 0.0  ;;  %4529 = vst [vmem:[#allocation81_spill] sm:$0xff] %v3718_v9  ;;  %v4530_v11 = vrot.slane %v3281_v16, %v3061_v8  ;;  %v3748_v16 = vadd.f32 %v1163_v61, %v3521_v5 }
 0x16a   : > { %v3721_v48 = vpop.permute.xlu0 %1160  ;;  %v3735_v40 = vadd.f32 %v1163_v61, %v4532_v54  ;;  %v1258_v25 = vmax.f32 %v1194_v0, 0.0  ;;  %v1259_v0 = vmax.f32 %v1195_v36, 0.0 }
 0x16b   : > { %v3730_v46 = vadd.f32 %v1163_v61, %v4530_v11  ;;  %v1776_v51 = vmul.f32 %v3208_v33, %v1256_v3  ;;  %v1777_v9 = vmul.f32 %v3214_v23, %v1257_v59  ;;  %v3739_v63 = vpop.permute.xlu1 %1166  ;;  %v3751_v11 = vadd.f32 %v1163_v61, %v3526_v43 }
 0x16c   : > { %4533 = vst [vmem:[#allocation83_spill] sm:$0xff] %v3735_v40  ;;  %v4534_v33 = vrot.slane %v3274_v13, %v3061_v8  ;;  %v4535_v3 = vrot.slane %v3292_v21, %v3061_v8  ;;  %v1186_v43 = vadd.f32 %v3721_v48, %v3535_v47  ;;  %v4537_v13 = vrot.slane %v3330_v15, %v3061_v8 }
 0x16d   : > { %4531 = vst [vmem:[#allocation82_spill] sm:$0xff] %v3730_v46  ;;  %v1888_v5 = vsel %vm287_vm0, %v1776_v51, -inf  ;;  %v1895_v59 = vsel %vm287_vm0, %v1777_v9, -inf  ;;  %v1209_v51 = vadd.f32 %v3739_v63, %v4538_v17  ;;  %v3782_v47 = vadd.f32 %v3721_v48, %v3544_v28 }
 0x16e   : > { %v1184_v23 = vadd.f32 %v3721_v48, %v4534_v33  ;;  %v1185_v34 = vadd.f32 %v3721_v48, %v4535_v3  ;;  %v1208_v61 = vadd.f32 %v3739_v63, %v4537_v13  ;;  %v4539_v15 = vrot.slane %v3289_v20, %v3061_v8  ;;  %v3792_v21 = vpop.permute.xlu0 %1738 }
 0x16f   : > { %v3778_v33 = vpop.permute.xlu1 %1164  ;;  %v1889_v13 = vrot.slane %v1888_v5, 4  ;;  %v1896_v30 = vrot.slane %v1895_v59, 4  ;;  %v1250_v40 = vmax.f32 %v1186_v43, 0.0  ;;  %v1273_v28 = vmax.f32 %v1209_v51, 0.0 }
 0x170   : > { %v3788_v9 = vadd.f32 %v3721_v48, %v4539_v15  ;;  %v1248_v54 = vmax.f32 %v1184_v23, 0.0  ;;  %v1249_v17 = vmax.f32 %v1185_v34, 0.0  ;;  %v1272_v46 = vmax.f32 %v1208_v61, 0.0 }
 0x171   : > { %v1200_v20 = vadd.f32 %v3778_v33, %v4540_v14  ;;  %v3799_v15 = vmul.f32 %v3218_v37, %v1258_v25  ;;  %v1210_v3 = vadd.f32 %v3739_v63, %v3567_v35  ;;  %v1211_v23 = vadd.f32 %v3739_v63, %v3576_v45 }
 0x172   : > { %v4541_v34 = vrot.slane %v3357_v49, %v3061_v8  ;;  %v3810_v61 = vmul.f32 %v3222_v39, %v1259_v0  ;;  %v4542_v37 = vrot.slane %v3346_v7, %v3061_v8  ;;  %v1792_v35 = vmul.f32 %v3238_v52, %v1272_v46  ;;  %v4562_v49 = vld [vmem:[#allocation34_spill] sm:$0xff] }
 0x173   : > { %v3820_v14 = vmax.f32 %v1888_v5, %v1889_v13  ;;  %v3822_v45 = vmax.f32 %v1895_v59, %v1896_v30  ;;  %v1793_v51 = vmul.f32 %v3236_v50, %v1273_v28  ;;  %v3827_v39 = vmul.f32 %v3204_v31, %v1248_v54  ;;  %v3841_v50 = vpop.permute.xlu0 %1170  ;;  %v4548_v28 = vld [vmem:[#allocation29_spill] sm:$0xff]  ;;  %v4558_v31 = vld [vmem:[#allocation43_spill] sm:$0xff] }
 0x174   : > { %v1201_v43 = vadd.f32 %v3778_v33, %v4541_v34  ;;  %v3817_v25 = vadd.f32 %v3739_v63, %v4542_v37  ;;  %v3830_v0 = vmul.f32 %v3206_v32, %v1249_v17  ;;  %v3833_v7 = vmul.f32 %v3210_v12, %v1250_v40  ;;  %4546 = vst [vmem:[#allocation87_spill] sm:$0xff] %v3841_v50  ;;  %v4552_v37 = vld [vmem:[#allocation18_spill] sm:$0xff] }
 0x175   : > { %v1264_v34 = vmax.f32 %v1200_v20, 0.0  ;;  %v4544_v52 = vrot.slane %v3360_v4, %v3061_v8  ;;  %v1274_v5 = vmax.f32 %v1210_v3, 0.0  ;;  %v1275_v59 = vmax.f32 %v1211_v23, 0.0 }
 0x176   : > { %4543 = vst [vmem:[#allocation85_spill] sm:$0xff] %v3817_v25  ;;  %v1265_v13 = vmax.f32 %v1201_v43, 0.0  ;;  %v2000_v32 = vsel %vm287_vm0, %v1792_v35, -inf  ;;  %v1202_v12 = vadd.f32 %v3778_v33, %v3595_v27  ;;  %v2007_v54 = vsel %vm287_vm0, %v1793_v51, -inf  ;;  %v4554_v51 = vld [vmem:[#allocation28_spill] sm:$0xff] }
 0x177   : > { %v3839_v46 = vadd.f32 %v3739_v63, %v4544_v52  ;;  %v1784_v40 = vmul.f32 %v3230_v44, %v1264_v34  ;;  %v1203_v4 = vadd.f32 %v3778_v33, %v3598_v18  ;;  %v4547_v3 = vrot.slane %v3354_v24, %v3061_v8 }
 0x178   : > { %v1785_v17 = vmul.f32 %v3224_v41, %v1265_v13  ;;  %v4549_v20 = vrot.slane %v4548_v28, %v3061_v8  ;;  %v4550_v23 = vrot.slane %v3379_v53, %v3061_v8  ;;  %v4551_v24 = vrot.slane %v3387_v10, %v3061_v8  ;;  %v3881_v28 = vpop.permute.xlu1 %1168 }
 0x179   : > { %4545 = vst [vmem:[#allocation86_spill] sm:$0xff] %v3839_v46  ;;  %v3855_v30 = vadd.f32 %v3778_v33, %v4547_v3  ;;  %v1944_v44 = vsel %vm287_vm0, %v1784_v40, -inf  ;;  %v3875_v35 = vmul.f32 %v4552_v37, %v1274_v5  ;;  %v3878_v34 = vmul.f32 %v4554_v51, %v1275_v59  ;;  %v4557_v59 = vld [vmem:[#allocation73_spill] sm:$0xff] }
 0x17a   : > { %v3862_v27 = vadd.f32 %v3778_v33, %v4549_v20  ;;  %v1224_v18 = vadd.f32 %v3841_v50, %v4550_v23  ;;  %v1225_v43 = vadd.f32 %v3841_v50, %v4551_v24  ;;  %v2001_v52 = vrot.slane %v2000_v32, 4  ;;  %v4556_v23 = vld [vmem:[#allocation71_spill] sm:$0xff] }
 0x17b   : > { %4553 = vst [vmem:[#allocation29_spill] sm:$0xff] %v3875_v35  ;;  %4555 = vst [vmem:[#allocation18_spill] sm:$0xff] %v3878_v34  ;;  %v2008_v13 = vrot.slane %v2007_v54, 4  ;;  %v1266_v40 = vmax.f32 %v1202_v12, 0.0  ;;  %v1951_v53 = vsel %vm287_vm0, %v1785_v17, -inf  ;;  %v1267_v20 = vmax.f32 %v1203_v4, 0.0 }
 0x17c   : > { %v1288_v3 = vmax.f32 %v1224_v18, 0.0  ;;  %v1945_v10 = vrot.slane %v1944_v44, 4  ;;  %v1226_v24 = vadd.f32 %v3841_v50, %v4556_v23  ;;  %v1289_v41 = vmax.f32 %v1225_v43, 0.0  ;;  %v4559_v17 = vld [vmem:[#allocation32_spill] sm:$0xff]  ;;  %v4571_v34 = vld [vmem:[#allocation19_spill] sm:$0xff] }
 0x17d   : > { %v1227_v51 = vadd.f32 %v3841_v50, %v4557_v59  ;;  %v1952_v36 = vrot.slane %v1951_v53, 4  ;;  %v4560_v18 = vrot.slane %v4559_v17, %v3061_v8  ;;  %v4563_v23 = vrot.slane %v4562_v49, %v3061_v8  ;;  %v3915_v49 = vpop.permute.xlu0 %1174  ;;  %v4583_v35 = vld [vmem:[#allocation59_spill] sm:$0xff] }
 0x17e   : > { %v1808_v12 = vmul.f32 %v4558_v31, %v1288_v3  ;;  %v4565_v37 = vrot.slane %v3391_v58, %v3061_v8  ;;  %v3906_v5 = vmax.f32 %v2000_v32, %v2001_v52  ;;  %v3908_v31 = vmax.f32 %v2007_v54, %v2008_v13  ;;  %v4568_v3 = vld [vmem:[#allocation42_spill] sm:$0xff] }
 0x17f   : > { %v3894_v4 = vadd.f32 %v3841_v50, %v4560_v18  ;;  %v3900_v43 = vadd.f32 %v3841_v50, %v4563_v23  ;;  %v1809_v17 = vmul.f32 %v4568_v3, %v1289_v41  ;;  %v4569_v18 = vrot.slane %v3404_v22, %v3061_v8  ;;  %v4570_v23 = vld [vmem:[#allocation10_spill] sm:$0xff] }
 0x180   : > { %v1216_v59 = vadd.f32 %v3881_v28, %v4565_v37  ;;  %4566 = vst [vmem:[#allocation73_spill] sm:$0xff] %v3906_v5  ;;  %4567 = vst [vmem:[#allocation43_spill] sm:$0xff] %v3908_v31  ;;  %v3918_v50 = vmul.f32 %v4570_v23, %v1266_v40  ;;  %v3921_v58 = vmul.f32 %v4571_v34, %v1267_v20  ;;  %v1290_v32 = vmax.f32 %v1226_v24, 0.0  ;;  %v4572_v20 = vld [vmem:[#allocation35_spill] sm:$0xff]  ;;  %v4573_v24 = vld [vmem:[#allocation30_spill] sm:$0xff] }
 0x181   : > { %4561 = vst [vmem:[#allocation28_spill] sm:$0xff] %v3894_v4  ;;  %4564 = vst [vmem:[#allocation71_spill] sm:$0xff] %v3900_v43  ;;  %v1217_v29 = vadd.f32 %v3881_v28, %v4569_v18  ;;  %v3923_v37 = vmax.f32 %v1944_v44, %v1945_v10  ;;  %v1291_v54 = vmax.f32 %v1227_v51, 0.0  ;;  %v2112_v52 = vsel %vm287_vm0, %v1808_v12, -inf  ;;  %v1173_v12 = vpop.permute.xlu1 %1172  ;;  %v4579_v18 = vld [vmem:[#allocation46_spill] sm:$0xff] }
 0x182   : > { %v1280_v41 = vmax.f32 %v1216_v59, 0.0  ;;  %v3926_v3 = vmax.f32 %v1951_v53, %v1952_v36  ;;  %v1218_v40 = vadd.f32 %v3881_v28, %v3657_v1  ;;  %v2119_v34 = vsel %vm287_vm0, %v1809_v17, -inf  ;;  %v4584_v5 = vld [vmem:[#allocation58_spill] sm:$0xff] }
 0x183   : > { %v1281_v13 = vmax.f32 %v1217_v29, 0.0  ;;  %v1219_v44 = vadd.f32 %v3881_v28, %v3664_v38  ;;  %v2113_v29 = vrot.slane %v2112_v52, 4  ;;  %v4574_v36 = vrot.slane %v3401_v62, %v3061_v8 }
 0x184   : > { %v1800_v10 = vmul.f32 %v4572_v20, %v1280_v41  ;;  %v4575_v1 = vrot.slane %v3413_v2, %v3061_v8  ;;  %v4576_v38 = vrot.slane %v3420_v19, %v3061_v8  ;;  %v1242_v62 = vadd.f32 %v3915_v49, %v3681_v26  ;;  %v1746_v20 = vpop.permute.xlu0 %1745  ;;  %v4577_v2 = vld [vmem:[#allocation36_spill] sm:$0xff]  ;;  %v4581_v26 = vld [vmem:[#allocation51_spill] sm:$0xff] }
 0x185   : > { %v1801_v51 = vmul.f32 %v4573_v24, %v1281_v13  ;;  %v3941_v53 = vadd.f32 %v3881_v28, %v4574_v36  ;;  %v1243_v13 = vadd.f32 %v3915_v49, %v3694_v60  ;;  %v2120_v24 = vrot.slane %v2119_v34, 4 }
 0x186   : > { %v1240_v59 = vadd.f32 %v3915_v49, %v4575_v1  ;;  %v1241_v17 = vadd.f32 %v3915_v49, %v4576_v38  ;;  %v2056_v23 = vsel %vm287_vm0, %v1800_v10, -inf  ;;  %v4578_v36 = vrot.slane %v4577_v2, %v3061_v8 }
 0x187   : > { %v2063_v41 = vsel %vm287_vm0, %v1801_v51, -inf  ;;  %v3964_v10 = vmul.f32 %v4579_v18, %v1290_v32  ;;  %v1282_v51 = vmax.f32 %v1218_v40, 0.0  ;;  %v1283_v22 = vmax.f32 %v1219_v44, 0.0  ;;  %v1704_v40 = vpop.permute.xlu1 %1703 }
 0x188   : > { %v3961_v1 = vadd.f32 %v3881_v28, %v4578_v36  ;;  %v1304_v19 = vmax.f32 %v1240_v59, 0.0  ;;  %v1305_v38 = vmax.f32 %v1241_v17, 0.0  ;;  %v2057_v43 = vrot.slane %v2056_v23, 4  ;;  %v4585_v36 = vld [vmem:[#allocation40_spill] sm:$0xff] }
 0x189   : > { %4580 = vst [vmem:[#allocation32_spill] sm:$0xff] %v3964_v10  ;;  %v3967_v4 = vmul.f32 %v4581_v26, %v1291_v54  ;;  %v2064_v60 = vrot.slane %v2063_v41, 4  ;;  %v1306_v2 = vmax.f32 %v1242_v62, 0.0  ;;  %v1307_v25 = vmax.f32 %v1243_v13, 0.0  ;;  %v4591_v13 = vld [vmem:[#allocation47_spill] sm:$0xff] }
 0x18a   : > { %v1824_v31 = vmul.f32 %v4583_v35, %v1304_v19  ;;  %v1825_v46 = vmul.f32 %v4584_v5, %v1305_v38  ;;  %v4586_v59 = vrot.slane %v4585_v36, %v3061_v8  ;;  %v4587_v32 = vrot.slane %v3438_v55, %v3061_v8  ;;  %v4590_v5 = vld [vmem:[#allocation37_spill] sm:$0xff]  ;;  %v4593_v36 = vld [vmem:[#allocation79_spill] sm:$0xff] }
 0x18b   : > { %4582 = vst [vmem:[#allocation34_spill] sm:$0xff] %v3967_v4  ;;  %v3977_v44 = vmax.f32 %v2112_v52, %v2113_v29  ;;  %v3979_v54 = vmax.f32 %v2119_v34, %v2120_v24  ;;  %v3984_v62 = vmul.f32 %v4590_v5, %v1282_v51  ;;  %v3987_v19 = vmul.f32 %v4591_v13, %v1283_v22  ;;  %v4594_v24 = vld [vmem:[#allocation39_spill] sm:$0xff]  ;;  %v4596_v22 = vld [vmem:[#allocation64_spill] sm:$0xff] }
 0x18c   : > { %v1232_v17 = vadd.f32 %v1173_v12, %v4586_v59  ;;  %v1233_v18 = vadd.f32 %v1173_v12, %v4587_v32  ;;  %v3989_v38 = vmax.f32 %v2056_v23, %v2057_v43  ;;  %v3992_v55 = vadd.f32 %v1173_v12, %v4593_v36  ;;  %v1753_v59 = vpop.permute.xlu0 %1752 }
 0x18d   : > { %4588 = vst [vmem:[#allocation42_spill] sm:$0xff] %v3977_v44  ;;  %4589 = vst [vmem:[#allocation10_spill] sm:$0xff] %v3979_v54  ;;  %v3994_v52 = vmax.f32 %v2063_v41, %v2064_v60  ;;  %v2224_v34 = vsel %vm287_vm0, %v1824_v31, -inf  ;;  %v3998_v29 = vsel %vm287_vm0, %v1825_v46, -inf  ;;  %v4595_v51 = vrot.slane %v4594_v24, %v3061_v8  ;;  %v4599_v41 = vld [vmem:[#allocation81_spill] sm:$0xff]  ;;  %v4602_v24 = vld [vmem:[#allocation80_spill] sm:$0xff] }
 0x18e   : > { %4592 = vst [vmem:[#allocation19_spill] sm:$0xff] %v3987_v19  ;;  %v4005_v5 = vmul.f32 %v4596_v22, %v1306_v2  ;;  %v4008_v43 = vmul.f32 %v3792_v21, %v1307_v25  ;;  %v1296_v23 = vmax.f32 %v1232_v17, 0.0  ;;  %v1297_v13 = vmax.f32 %v1233_v18, 0.0  ;;  %v4600_v31 = vld [vmem:[#allocation41_spill] sm:$0xff]  ;;  %v1711_v17 = vpop.permute.xlu1 %1710 }
 0x18f   : > { %v1244_v32 = vadd.f32 %v3915_v49, %v4595_v51  ;;  %v4011_v60 = vadd.f32 %v1173_v12, %v4599_v41  ;;  %v4601_v46 = vrot.slane %v4600_v31, %v3061_v8  ;;  %v1238_v26 = vadd.f32 %v1173_v12, %v4602_v24  ;;  %v4605_v24 = vld [vmem:[#allocation52_spill] sm:$0xff] }
 0x190   : > { %4597 = vst [vmem:[#allocation35_spill] sm:$0xff] %v4005_v5  ;;  %4598 = vst [vmem:[#allocation30_spill] sm:$0xff] %v4008_v43  ;;  %v2225_v51 = vrot.slane %v2224_v34, 4  ;;  %v2232_v2 = vrot.slane %v3998_v29, 4  ;;  %v4603_v21 = vrot.slane %v3454_v56, %v3061_v8  ;;  %v4604_v18 = vrot.slane %v3451_v42, %v3061_v8  ;;  %v4606_v5 = vld [vmem:[#allocation55_spill] sm:$0xff]  ;;  %v1760_v54 = vpop.permute.xlu0 %1759 }
 0x191   : > { %v4016_v36 = vadd.f32 %v1173_v12, %v4601_v46  ;;  %v1308_v35 = vmax.f32 %v1244_v32, 0.0  ;;  %v1302_v31 = vmax.f32 %v1238_v26, 0.0  ;;  %v1239_v46 = vadd.f32 %v1173_v12, %v3742_v6  ;;  %v4607_v26 = vld [vmem:[#allocation78_spill] sm:$0xff]  ;;  %v4608_v6 = vld [vmem:[#allocation84_spill] sm:$0xff] }
 0x192   : > { %v1245_v25 = vadd.f32 %v3915_v49, %v4603_v21  ;;  %v1237_v22 = vadd.f32 %v1173_v12, %v4604_v18  ;;  %v1246_v32 = vadd.f32 %v3915_v49, %v3745_v57  ;;  %v1816_v43 = vmul.f32 %v4605_v24, %v1296_v23 }
 0x193   : > { %v1828_v41 = vmul.f32 %v1746_v20, %v1308_v35  ;;  %v1817_v4 = vmul.f32 %v4606_v5, %v1297_v13  ;;  %v1822_v44 = vmul.f32 %v1704_v40, %v1302_v31  ;;  %v1303_v19 = vmax.f32 %v1239_v46, 0.0  ;;  %v1767_v31 = vpop.permute.xlu1 %1766 }
 0x194   : > { %v1309_v10 = vmax.f32 %v1245_v25, 0.0  ;;  %v1301_v56 = vmax.f32 %v1237_v22, 0.0  ;;  %v1310_v42 = vmax.f32 %v1246_v32, 0.0  ;;  %v1247_v57 = vadd.f32 %v3915_v49, %v4608_v6 }
 0x195   : > { %v2252_v21 = vsel %vm287_vm0, %v1828_v41, -inf  ;;  %v1298_v12 = vmax.f32 %v3992_v55, 0.0  ;;  %v2210_v5 = vsel %vm287_vm0, %v1822_v44, -inf  ;;  %v1823_v23 = vmul.f32 %v1711_v17, %v1303_v19  ;;  %v4609_v17 = vld [vmem:[#allocation22_spill] sm:$0xff] }
 0x196   : > { %v2253_v18 = vrot.slane %v2252_v21, 4  ;;  %v1829_v20 = vmul.f32 %v1753_v59, %v1309_v10  ;;  %v4034_v35 = vmul.f32 %v4607_v26, %v1301_v56  ;;  %v1830_v13 = vmul.f32 %v1760_v54, %v1310_v42 }
 0x197   : > { %v2168_v25 = vsel %vm287_vm0, %v1816_v43, -inf  ;;  %v2211_v40 = vrot.slane %v2210_v5, 4  ;;  %v2217_v59 = vsel %vm287_vm0, %v1823_v23, -inf  ;;  %v1311_v32 = vmax.f32 %v1247_v57, 0.0 }
 0x198   : > { %v2254_v22 = vmax.f32 %v2252_v21, %v2253_v18  ;;  %v2259_v41 = vsel %vm287_vm0, %v1829_v20, -inf  ;;  %v2266_v46 = vsel %vm287_vm0, %v1830_v13, -inf  ;;  %v2175_v49 = vsel %vm287_vm0, %v1817_v4, -inf  ;;  %v4611_v21 = vld [vmem:[#allocation62_spill] sm:$0xff] }
 0x199   : > { %v2260_v10 = vrot.slane %v2259_v41, 4  ;;  %v2212_v55 = vmax.f32 %v2210_v5, %v2211_v40  ;;  %v2218_v24 = vrot.slane %v2217_v59, 4  ;;  %v2267_v44 = vrot.slane %v2266_v46, 4 }
 0x19a   : > { %v1831_v54 = vmul.f32 %v1767_v31, %v1311_v32  ;;  %v4610_v43 = vrot.slane %v4609_v17, %v3061_v8  ;;  %v1190_v42 = vadd.f32 %v3721_v48, %v4611_v21  ;;  %v1299_v18 = vmax.f32 %v4011_v60, 0.0  ;;  %v4613_v60 = vld [vmem:[#allocation56_spill] sm:$0xff]  ;;  %v4618_v21 = vld [vmem:[#allocation6_spill] sm:$0xff] }
 0x19b   : > { %v2261_v19 = vmax.f32 %v2259_v41, %v2260_v10  ;;  %v2169_v20 = vrot.slane %v2168_v25, 4  ;;  %v2213_v26 = vrot.slane %v2212_v55, 2  ;;  %v2219_v6 = vmax.f32 %v2217_v59, %v2218_v24  ;;  %v4612_v41 = vld [vmem:[#allocation63_spill] sm:$0xff]  ;;  %v4614_v59 = vld [vmem:[#allocation65_spill] sm:$0xff] }
 0x19c   : > { %v1189_v56 = vadd.f32 %v3721_v48, %v4610_v43  ;;  %v4052_v57 = vmax.f32 %v2224_v34, %v2225_v51  ;;  %v2176_v5 = vrot.slane %v2175_v49, 4  ;;  %v2255_v23 = vrot.slane %v2254_v22, 2 }
 0x19d   : > { %v2262_v13 = vrot.slane %v2261_v19, 2  ;;  %v4055_v40 = vmax.f32 %v2266_v46, %v2267_v44  ;;  %v2273_v8 = vsel %vm287_vm0, %v1831_v54, -inf  ;;  %v1191_v31 = vadd.f32 %v3721_v48, %v4612_v41 }
 0x19e   : > { %v4061_v10 = vmax.f32 %v3998_v29, %v2232_v2  ;;  %v4064_v32 = vmul.f32 %v4613_v60, %v1298_v12  ;;  %v1253_v34 = vmax.f32 %v1189_v56, 0.0  ;;  %v1254_v51 = vmax.f32 %v1190_v42, 0.0  ;;  %v4616_v29 = vld [vmem:[#allocation5_spill] sm:$0xff] }
 0x19f   : > { %v4067_v24 = vmul.f32 %v4614_v59, %v1299_v18  ;;  %v4069_v17 = vmax.f32 %v2168_v25, %v2169_v20  ;;  %v4071_v46 = vmax.f32 %v2212_v55, %v2213_v26  ;;  %v2220_v44 = vrot.slane %v2219_v6, 2  ;;  %v4620_v20 = vld [vmem:[#allocation8_spill] sm:$0xff] }
 0x1a0   : > { %v4073_v54 = vmax.f32 %v2175_v49, %v2176_v5  ;;  %v2274_v43 = vrot.slane %v2273_v8, 4  ;;  %v4615_v48 = vmax.f32 %v3782_v47, 0.0  ;;  %v4617_v12 = vmax.f32 %v3788_v9, 0.0  ;;  %v4621_v49 = vld [vmem:[#allocation9_spill] sm:$0xff] }
 0x1a1   : > { %v4081_v42 = vmax.f32 %v2254_v22, %v2255_v23  ;;  %v4083_v18 = vmax.f32 %v2261_v19, %v2262_v13  ;;  %v1255_v55 = vmax.f32 %v1191_v31, 0.0  ;;  %v1773_v26 = vmul.f32 %v4620_v20, %v1253_v34 }
 0x1a2   : > { %v1771_v2 = vmul.f32 %v4616_v29, %v4615_v48  ;;  %v1772_v56 = vmul.f32 %v4618_v21, %v4617_v12  ;;  %v1774_v5 = vmul.f32 %v4621_v49, %v1254_v51  ;;  %v1832_v47 = vsel %vm287_vm0, %v3827_v39, -inf }
 0x1a3   : > { %4619 = vst [vmem:[#allocation36_spill] sm:$0xff] %v4081_v42  ;;  %v1839_v41 = vsel %vm287_vm0, %v3830_v0, -inf  ;;  %v4093_v60 = vmax.f32 %v2219_v6, %v2220_v44  ;;  %v1833_v22 = vrot.slane %v1832_v47, 4  ;;  %v4095_v23 = vmax.f32 %v2273_v8, %v2274_v43  ;;  %v4622_v0 = vld [vmem:[#allocation15_spill] sm:$0xff] }
 0x1a4   : > { %v1840_v19 = vrot.slane %v1839_v41, 4  ;;  %v1846_v13 = vsel %vm287_vm0, %v3833_v7, -inf  ;;  %v1853_v31 = vsel %vm287_vm0, %v1771_v2, -inf  ;;  %v1860_v34 = vsel %vm287_vm0, %v1772_v56, -inf }
 0x1a5   : > { %v1834_v51 = vmax.f32 %v1832_v47, %v1833_v22  ;;  %v1847_v59 = vrot.slane %v1846_v13, 4  ;;  %v1854_v48 = vrot.slane %v1853_v31, 4  ;;  %v1775_v29 = vmul.f32 %v4622_v0, %v1255_v55 }
 0x1a6   : > { %v1841_v39 = vmax.f32 %v1839_v41, %v1840_v19  ;;  %v1861_v12 = vrot.slane %v1860_v34, 4  ;;  %v1867_v6 = vsel %vm287_vm0, %v1773_v26, -inf  ;;  %v1874_v44 = vsel %vm287_vm0, %v1774_v5, -inf }
 0x1a7   : > { %v1835_v8 = vrot.slane %v1834_v51, 2  ;;  %v1848_v21 = vmax.f32 %v1846_v13, %v1847_v59  ;;  %v1855_v7 = vmax.f32 %v1853_v31, %v1854_v48  ;;  %v1868_v56 = vrot.slane %v1867_v6, 4 }
 0x1a8   : > { %v1842_v43 = vrot.slane %v1841_v39, 2  ;;  %v1862_v20 = vmax.f32 %v1860_v34, %v1861_v12  ;;  %v1875_v49 = vrot.slane %v1874_v44, 4  ;;  %v1881_v5 = vsel %vm287_vm0, %v1775_v29, -inf }
 0x1a9   : > { %v1836_v47 = vmax.f32 %v1834_v51, %v1835_v8  ;;  %v1849_v22 = vrot.slane %v1848_v21, 2  ;;  %v1856_v55 = vrot.slane %v1855_v7, 2  ;;  %v1869_v26 = vmax.f32 %v1867_v6, %v1868_v56 }
 0x1aa   : > { %v1843_v41 = vmax.f32 %v1841_v39, %v1842_v43  ;;  %v1863_v19 = vrot.slane %v1862_v20, 2  ;;  %v1876_v0 = vmax.f32 %v1874_v44, %v1875_v49  ;;  %v1882_v2 = vrot.slane %v1881_v5, 4 }
 0x1ab   : > { %v1837_v9 = vrot.slane %v1836_v47, 1  ;;  %v1850_v31 = vmax.f32 %v1848_v21, %v1849_v22  ;;  %v1857_v59 = vmax.f32 %v1855_v7, %v1856_v55  ;;  %v1870_v48 = vrot.slane %v1869_v26, 2  ;;  %v4623_v21 = vld [vmem:[#allocation82_spill] sm:$0xff] }
 0x1ac   : > { %v1844_v13 = vrot.slane %v1843_v41, 1  ;;  %v1864_v34 = vmax.f32 %v1862_v20, %v1863_v19  ;;  %v1877_v12 = vrot.slane %v1876_v0, 2  ;;  %v1883_v56 = vmax.f32 %v1881_v5, %v1882_v2  ;;  %v4625_v20 = vld [vmem:[#allocation7_spill] sm:$0xff]  ;;  %v4630_v5 = vld [vmem:[#allocation13_spill] sm:$0xff] }
 0x1ad   : > { %v1838_v51 = vmax.f32 %v1836_v47, %v1837_v9  ;;  %v1851_v8 = vrot.slane %v1850_v31, 1  ;;  %v1858_v43 = vrot.slane %v1857_v59, 1  ;;  %v1871_v6 = vmax.f32 %v1869_v26, %v1870_v48  ;;  %v4628_v26 = vld [vmem:[#allocation11_spill] sm:$0xff]  ;;  %v4632_v48 = vld [vmem:[#allocation26_spill] sm:$0xff] }
 0x1ae   : > { %v1845_v39 = vmax.f32 %v1843_v41, %v1844_v13  ;;  %v1865_v25 = vrot.slane %v1864_v34, 1  ;;  %v1878_v44 = vmax.f32 %v1876_v0, %v1877_v12  ;;  %v4624_v7 = vmax.f32 %v4623_v21, 0.0  ;;  %v4626_v41 = vld [vmem:[#allocation83_spill] sm:$0xff] }
 0x1af   : > { %v1852_v29 = vmax.f32 %v1850_v31, %v1851_v8  ;;  %v1859_v49 = vmax.f32 %v1857_v59, %v1858_v43  ;;  %v1872_v19 = vrot.slane %v1871_v6, 1  ;;  %v1884_v9 = vrot.slane %v1883_v56, 2 }
 0x1b0   : > { %v2349_v4 = vsel %vm2348_vm1, %v1845_v39, %v1838_v51  ;;  %v1780_v22 = vmul.f32 %v4625_v20, %v4624_v7  ;;  %v1866_v55 = vmax.f32 %v1864_v34, %v1865_v25  ;;  %v1879_v42 = vrot.slane %v1878_v44, 1 }
 0x1b1   : > { %v2351_v47 = vsel %vm2350_vm2, %v1852_v29, %v2349_v4  ;;  %v4627_v13 = vmax.f32 %v4626_v41, 0.0  ;;  %v4629_v2 = vmax.f32 %v3748_v16, 0.0  ;;  %v4631_v59 = vmax.f32 %v3751_v11, 0.0 }
 0x1b2   : > { %v1873_v51 = vmax.f32 %v1871_v6, %v1872_v19  ;;  %v1880_v39 = vmax.f32 %v1878_v44, %v1879_v42  ;;  %v1885_v25 = vmax.f32 %v1883_v56, %v1884_v9  ;;  %v2353_v34 = vsel %vm2352_vm3, %v1859_v49, %v2351_v47 }
 0x1b3   : > { %v1781_v0 = vmul.f32 %v4628_v26, %v4627_v13  ;;  %v1782_v31 = vmul.f32 %v4630_v5, %v4629_v2  ;;  %v1783_v12 = vmul.f32 %v4632_v48, %v4631_v59  ;;  %v2355_v8 = vsel %vm2354_vm4, %v1866_v55, %v2353_v34 }
 0x1b4   : > { %v1891_v4 = vrot.slane %v3820_v14, 2  ;;  %v1898_v43 = vrot.slane %v3822_v45, 2  ;;  %v1902_v16 = vsel %vm287_vm0, %v3799_v15, -inf  ;;  %v1886_v29 = vrot.slane %v1885_v25, 1 }
 0x1b5   : > { %v2357_v21 = vsel %vm2356_vm5, %v1873_v51, %v2355_v8  ;;  %v1903_v11 = vrot.slane %v1902_v16, 4  ;;  %v1909_v6 = vsel %vm287_vm0, %v3810_v61, -inf  ;;  %v1916_v55 = vsel %vm287_vm0, %v1780_v22, -inf }
 0x1b6   : > { %v2359_v42 = vsel %vm2358_vm6, %v1880_v39, %v2357_v21  ;;  %v1892_v44 = vmax.f32 %v3820_v14, %v1891_v4  ;;  %v1899_v56 = vmax.f32 %v3822_v45, %v1898_v43  ;;  %v1910_v49 = vrot.slane %v1909_v6, 4 }
 0x1b7   : > { %v1887_v7 = vmax.f32 %v1885_v25, %v1886_v29  ;;  %v1904_v20 = vmax.f32 %v1902_v16, %v1903_v11  ;;  %v1923_v15 = vsel %vm287_vm0, %v1781_v0, -inf  ;;  %v1917_v41 = vrot.slane %v1916_v55, 4 }
 0x1b8   : > { %v1893_v19 = vrot.slane %v1892_v44, 1  ;;  %v1900_v9 = vrot.slane %v1899_v56, 1  ;;  %v1911_v47 = vmax.f32 %v1909_v6, %v1910_v49  ;;  %v1924_v26 = vrot.slane %v1923_v15, 4 }
 0x1b9   : > { %v2361_v13 = vsel %vm2360_vm7, %v1887_v7, %v2359_v42  ;;  %v1905_v61 = vrot.slane %v1904_v20, 2  ;;  %v1930_v2 = vsel %vm287_vm0, %v1782_v31, -inf  ;;  %v1918_v59 = vmax.f32 %v1916_v55, %v1917_v41  ;;  %v4633_v31 = vld [vmem:[#allocation68_spill] sm:$0xff]  ;;  %v4634_v42 = vld [vmem:[#allocation69_spill] sm:$0xff] }
 0x1ba   : > { %2810 = vmatprep.mubr.msk.f32.mxu1 %vm287_vm0, %v2361_v13  ;;  %v1894_v14 = vmax.f32 %v1892_v44, %v1893_v19  ;;  %v1901_v45 = vmax.f32 %v1899_v56, %v1900_v9  ;;  %v1912_v5 = vrot.slane %v1911_v47, 2  ;;  %v1925_v22 = vmax.f32 %v1923_v15, %v1924_v26 }
 0x1bb   : > { %v1906_v48 = vmax.f32 %v1904_v20, %v1905_v61  ;;  %v1931_v51 = vrot.slane %v1930_v2, 4  ;;  %v1937_v0 = vsel %vm287_vm0, %v1783_v12, -inf  ;;  %v1919_v25 = vrot.slane %v1918_v59, 2  ;;  %v4636_v61 = vld [vmem:[#allocation24_spill] sm:$0xff] }
 0x1bc   : > { %v1913_v39 = vmax.f32 %v1911_v47, %v1912_v5  ;;  %v1938_v34 = vrot.slane %v1937_v0, 4  ;;  %v2362_v8 = vsel %vm2348_vm1, %v1901_v45, %v1894_v14  ;;  %v1926_v43 = vrot.slane %v1925_v22, 2  ;;  %v4638_v5 = vld [vmem:[#allocation31_spill] sm:$0xff] }
 0x1bd   : > { %v1907_v4 = vrot.slane %v1906_v48, 1  ;;  %v1932_v16 = vmax.f32 %v1930_v2, %v1931_v51  ;;  %v1206_v29 = vadd.f32 %v3778_v33, %v4633_v31  ;;  %v1920_v11 = vmax.f32 %v1918_v59, %v1919_v25  ;;  %v4639_v51 = vld [vmem:[#allocation33_spill] sm:$0xff] }
 0x1be   : > { %v1914_v21 = vrot.slane %v1913_v39, 1  ;;  %v1939_v6 = vmax.f32 %v1937_v0, %v1938_v34  ;;  %v1207_v44 = vadd.f32 %v3778_v33, %v4634_v42  ;;  %v1927_v49 = vmax.f32 %v1925_v22, %v1926_v43 }
 0x1bf   : > { %v1908_v56 = vmax.f32 %v1906_v48, %v1907_v4  ;;  %v1933_v12 = vrot.slane %v1932_v16, 2  ;;  %v1270_v7 = vmax.f32 %v1206_v29, 0.0  ;;  %v1921_v55 = vrot.slane %v1920_v11, 1 }
 0x1c0   : > { %v1915_v20 = vmax.f32 %v1913_v39, %v1914_v21  ;;  %v1940_v15 = vrot.slane %v1939_v6, 2  ;;  %v1271_v19 = vmax.f32 %v1207_v44, 0.0  ;;  %v1928_v9 = vrot.slane %v1927_v49, 1  ;;  %v4640_v39 = vld [vmem:[#allocation45_spill] sm:$0xff] }
 0x1c1   : > { %v1934_v47 = vmax.f32 %v1932_v16, %v1933_v12  ;;  %v2363_v41 = vsel %vm2350_vm2, %v1908_v56, %v2362_v8  ;;  %v4635_v13 = vmax.f32 %v3855_v30, 0.0  ;;  %v1922_v2 = vmax.f32 %v1920_v11, %v1921_v55 }
 0x1c2   : > { %v1941_v14 = vmax.f32 %v1939_v6, %v1940_v15  ;;  %v2364_v33 = vsel %vm2352_vm3, %v1915_v20, %v2363_v41  ;;  %v4637_v45 = vmax.f32 %v3862_v27, 0.0  ;;  %v1929_v48 = vmax.f32 %v1927_v49, %v1928_v9 }
 0x1c3   : > { %v1788_v26 = vmul.f32 %v4636_v61, %v4635_v13  ;;  %v1935_v22 = vrot.slane %v1934_v47, 1  ;;  %v1790_v0 = vmul.f32 %v4639_v51, %v1270_v7  ;;  %v1791_v25 = vmul.f32 %v4640_v39, %v1271_v19 }
 0x1c4   : > { %v1789_v59 = vmul.f32 %v4638_v5, %v4637_v45  ;;  %v1942_v34 = vrot.slane %v1941_v14, 1  ;;  %v2365_v8 = vsel %vm2354_vm4, %v1922_v2, %v2364_v33  ;;  %v1947_v30 = vrot.slane %v3923_v37, 2 }
 0x1c5   : > { %v1954_v4 = vrot.slane %v3926_v3, 2  ;;  %v1936_v43 = vmax.f32 %v1934_v47, %v1935_v22  ;;  %v2366_v16 = vsel %vm2356_vm5, %v1929_v48, %v2365_v8  ;;  %v1958_v27 = vsel %vm287_vm0, %v3918_v50, -inf  ;;  %v4641_v22 = vld [vmem:[#allocation66_spill] sm:$0xff]  ;;  %v4642_v8 = vld [vmem:[#allocation67_spill] sm:$0xff] }
 0x1c6   : > { %v1965_v31 = vsel %vm287_vm0, %v3921_v58, -inf  ;;  %v1943_v29 = vmax.f32 %v1941_v14, %v1942_v34  ;;  %v1948_v21 = vmax.f32 %v3923_v37, %v1947_v30  ;;  %v1959_v6 = vrot.slane %v1958_v27, 4 }
 0x1c7   : > { %v1955_v11 = vmax.f32 %v3926_v3, %v1954_v4  ;;  %v2367_v42 = vsel %vm2358_vm6, %v1936_v43, %v2366_v16  ;;  %v1966_v44 = vrot.slane %v1965_v31, 4  ;;  %v1972_v56 = vsel %vm287_vm0, %v1788_v26, -inf }
 0x1c8   : > { %v1979_v49 = vsel %vm287_vm0, %v1789_v59, -inf  ;;  %v2368_v12 = vsel %vm2360_vm7, %v1943_v29, %v2367_v42  ;;  %v1949_v7 = vrot.slane %v1948_v21, 1  ;;  %v1960_v20 = vmax.f32 %v1958_v27, %v1959_v6 }
 0x1c9   : > { %v1956_v50 = vrot.slane %v1955_v11, 1  ;;  %2811 = vmatmul.mubr.msk.f32.vlgmr.msra.gmra.mrb[0].mxu1 %vm287_vm0, %v2368_v12  ;;  %v1967_v58 = vmax.f32 %v1965_v31, %v1966_v44  ;;  %v1973_v55 = vrot.slane %v1972_v56, 4  ;;  %v1980_v37 = vrot.slane %v1979_v49, 4  ;;  %v4643_v44 = vld [vmem:[#allocation85_spill] sm:$0xff] }
 0x1ca   : > { %v1986_v3 = vsel %vm287_vm0, %v1790_v0, -inf  ;;  %v1950_v15 = vmax.f32 %v1948_v21, %v1949_v7  ;;  %v1961_v9 = vrot.slane %v1960_v20, 2  ;;  %v1993_v26 = vsel %vm287_vm0, %v1791_v25, -inf }
 0x1cb   : > { %v1957_v19 = vmax.f32 %v1955_v11, %v1956_v50  ;;  %v1987_v47 = vrot.slane %v1986_v3, 4  ;;  %v1968_v41 = vrot.slane %v1967_v58, 2  ;;  %v1974_v13 = vmax.f32 %v1972_v56, %v1973_v55  ;;  %v4648_v55 = vld [vmem:[#allocation38_spill] sm:$0xff] }
 0x1cc   : > { %v1981_v61 = vmax.f32 %v1979_v49, %v1980_v37  ;;  %v1962_v2 = vmax.f32 %v1960_v20, %v1961_v9  ;;  %v1994_v33 = vrot.slane %v1993_v26, 4  ;;  %v1214_v51 = vadd.f32 %v3739_v63, %v4641_v22  ;;  %v4645_v49 = vld [vmem:[#allocation27_spill] sm:$0xff]  ;;  %v4649_v9 = vld [vmem:[#allocation44_spill] sm:$0xff]  ;;  %v4654_v22 = vld [vmem:[#allocation18_spill] sm:$0xff] }
 0x1cd   : > { %v1988_v14 = vmax.f32 %v1986_v3, %v1987_v47  ;;  %v2369_v45 = vsel %vm2348_vm1, %v1957_v19, %v1950_v15  ;;  %v1969_v5 = vmax.f32 %v1967_v58, %v1968_v41  ;;  %v1975_v59 = vrot.slane %v1974_v13, 2 }
 0x1ce   : > { %v1982_v48 = vrot.slane %v1981_v61, 2  ;;  %v1963_v0 = vrot.slane %v1962_v2, 1  ;;  %v1995_v34 = vmax.f32 %v1993_v26, %v1994_v33  ;;  %v1215_v30 = vadd.f32 %v3739_v63, %v4642_v8  ;;  %v4646_v63 = vld [vmem:[#allocation86_spill] sm:$0xff] }
 0x1cf   : > { %v1989_v39 = vrot.slane %v1988_v14, 2  ;;  %v1970_v4 = vrot.slane %v1969_v5, 1  ;;  %v1976_v43 = vmax.f32 %v1974_v13, %v1975_v59  ;;  %v1278_v16 = vmax.f32 %v1214_v51, 0.0  ;;  %v4653_v59 = vld [vmem:[#allocation29_spill] sm:$0xff] }
 0x1d0   : > { %v1983_v25 = vmax.f32 %v1981_v61, %v1982_v48  ;;  %v1964_v27 = vmax.f32 %v1962_v2, %v1963_v0  ;;  %v1996_v29 = vrot.slane %v1995_v34, 2  ;;  %v1279_v21 = vmax.f32 %v1215_v30, 0.0  ;;  %v4650_v61 = vld [vmem:[#allocation49_spill] sm:$0xff] }
 0x1d1   : > { %v1990_v31 = vmax.f32 %v1988_v14, %v1989_v39  ;;  %v1971_v11 = vmax.f32 %v1969_v5, %v1970_v4  ;;  %v1977_v6 = vrot.slane %v1976_v43, 1  ;;  %v4644_v56 = vmax.f32 %v4643_v44, 0.0  ;;  %v4651_v2 = vld [vmem:[#allocation73_spill] sm:$0xff]  ;;  %v4652_v5 = vld [vmem:[#allocation43_spill] sm:$0xff] }
 0x1d2   : > { %v1984_v42 = vrot.slane %v1983_v25, 1  ;;  %v1997_v50 = vmax.f32 %v1995_v34, %v1996_v29  ;;  %v2370_v20 = vsel %vm2350_vm2, %v1964_v27, %v2369_v45  ;;  %v4647_v58 = vmax.f32 %v4646_v63, 0.0 }
 0x1d3   : > { %v1796_v12 = vmul.f32 %v4645_v49, %v4644_v56  ;;  %v1991_v7 = vrot.slane %v1990_v31, 1  ;;  %v1978_v3 = vmax.f32 %v1976_v43, %v1977_v6  ;;  %v2371_v19 = vsel %vm2352_vm3, %v1971_v11, %v2370_v20 }
 0x1d4   : > { %v1797_v37 = vmul.f32 %v4648_v55, %v4647_v58  ;;  %v1985_v15 = vmax.f32 %v1983_v25, %v1984_v42  ;;  %v1798_v47 = vmul.f32 %v4649_v9, %v1278_v16  ;;  %v1998_v13 = vrot.slane %v1997_v50, 1 }
 0x1d5   : > { %v1992_v41 = vmax.f32 %v1990_v31, %v1991_v7  ;;  %v1799_v26 = vmul.f32 %v4650_v61, %v1279_v21  ;;  %v2003_v14 = vrot.slane %v4651_v2, 2  ;;  %v2372_v33 = vsel %vm2354_vm4, %v1978_v3, %v2371_v19 }
 0x1d6   : > { %v2010_v45 = vrot.slane %v4652_v5, 2  ;;  %v2014_v48 = vsel %vm287_vm0, %v4653_v59, -inf  ;;  %v2021_v51 = vsel %vm287_vm0, %v4654_v22, -inf  ;;  %v1999_v0 = vmax.f32 %v1997_v50, %v1998_v13 }
 0x1d7   : > { %v2373_v39 = vsel %vm2356_vm5, %v1985_v15, %v2372_v33  ;;  %v2004_v34 = vmax.f32 %v4651_v2, %v2003_v14  ;;  %v2015_v8 = vrot.slane %v2014_v48, 4  ;;  %v2022_v43 = vrot.slane %v2021_v51, 4 }
 0x1d8   : > { %v2374_v30 = vsel %vm2358_vm6, %v1992_v41, %v2373_v39  ;;  %v2011_v4 = vmax.f32 %v4652_v5, %v2010_v45  ;;  %v2028_v25 = vsel %vm287_vm0, %v1796_v12, -inf  ;;  %v2035_v6 = vsel %vm287_vm0, %v1797_v37, -inf  ;;  %v4655_v37 = vld [vmem:[#allocation76_spill] sm:$0xff]  ;;  %v4656_v45 = vld [vmem:[#allocation77_spill] sm:$0xff] }
 0x1d9   : > { %v2375_v16 = vsel %vm2360_vm7, %v1999_v0, %v2374_v30  ;;  %v2005_v27 = vrot.slane %v2004_v34, 1  ;;  %v2016_v31 = vmax.f32 %v2014_v48, %v2015_v8  ;;  %v2029_v29 = vrot.slane %v2028_v25, 4 }
 0x1da   : > { %2813 = vmatprep.mubr.msk.f32.mxu1 %vm287_vm0, %v2375_v16  ;;  %v2012_v21 = vrot.slane %v2011_v4, 1  ;;  %v2023_v11 = vmax.f32 %v2021_v51, %v2022_v43  ;;  %v2042_v42 = vsel %vm287_vm0, %v1798_v47, -inf  ;;  %v2036_v7 = vrot.slane %v2035_v6, 4 }
 0x1db   : > { %v2006_v44 = vmax.f32 %v2004_v34, %v2005_v27  ;;  %v2017_v56 = vrot.slane %v2016_v31, 2  ;;  %v2030_v49 = vmax.f32 %v2028_v25, %v2029_v29  ;;  %v2043_v12 = vrot.slane %v2042_v42, 4 }
 0x1dc   : > { %v2013_v50 = vmax.f32 %v2011_v4, %v2012_v21  ;;  %v2024_v20 = vrot.slane %v2023_v11, 2  ;;  %v2049_v63 = vsel %vm287_vm0, %v1799_v26, -inf  ;;  %v2037_v3 = vmax.f32 %v2035_v6, %v2036_v7  ;;  %v4658_v4 = vld [vmem:[#allocation48_spill] sm:$0xff]  ;;  %v4662_v7 = vld [vmem:[#allocation61_spill] sm:$0xff] }
 0x1dd   : > { %v2018_v58 = vmax.f32 %v2016_v31, %v2017_v56  ;;  %v2031_v55 = vrot.slane %v2030_v49, 2  ;;  %v2050_v15 = vrot.slane %v2049_v63, 4  ;;  %v2044_v9 = vmax.f32 %v2042_v42, %v2043_v12  ;;  %v4661_v42 = vld [vmem:[#allocation54_spill] sm:$0xff] }
 0x1de   : > { %v2025_v19 = vmax.f32 %v2023_v11, %v2024_v20  ;;  %v2376_v41 = vsel %vm2348_vm1, %v2013_v50, %v2006_v44  ;;  %v1222_v47 = vadd.f32 %v3881_v28, %v4655_v37  ;;  %v2038_v2 = vrot.slane %v2037_v3, 2  ;;  %v4660_v11 = vld [vmem:[#allocation50_spill] sm:$0xff] }
 0x1df   : > { %v2019_v13 = vrot.slane %v2018_v58, 1  ;;  %v2032_v61 = vmax.f32 %v2030_v49, %v2031_v55  ;;  %v2051_v14 = vmax.f32 %v2049_v63, %v2050_v15  ;;  %v2045_v5 = vrot.slane %v2044_v9, 2  ;;  %v4663_v15 = vld [vmem:[#allocation19_spill] sm:$0xff] }
 0x1e0   : > { %v2026_v33 = vrot.slane %v2025_v19, 1  ;;  %v1223_v26 = vadd.f32 %v3881_v28, %v4656_v45  ;;  %v1286_v59 = vmax.f32 %v1222_v47, 0.0  ;;  %v2039_v51 = vmax.f32 %v2037_v3, %v2038_v2 }
 0x1e1   : > { %v2020_v48 = vmax.f32 %v2018_v58, %v2019_v13  ;;  %v2033_v22 = vrot.slane %v2032_v61, 1  ;;  %v2052_v0 = vrot.slane %v2051_v14, 2  ;;  %v2046_v34 = vmax.f32 %v2044_v9, %v2045_v5 }
 0x1e2   : > { %v2027_v39 = vmax.f32 %v2025_v19, %v2026_v33  ;;  %v1287_v8 = vmax.f32 %v1223_v26, 0.0  ;;  %v4657_v30 = vmax.f32 %v3941_v53, 0.0  ;;  %v2040_v16 = vrot.slane %v2039_v51, 1 }
 0x1e3   : > { %v2034_v25 = vmax.f32 %v2032_v61, %v2033_v22  ;;  %v2053_v27 = vmax.f32 %v2051_v14, %v2052_v0  ;;  %v2377_v31 = vsel %vm2350_vm2, %v2020_v48, %v2376_v41  ;;  %v2047_v29 = vrot.slane %v2046_v34, 1 }
 0x1e4   : > { %v1804_v43 = vmul.f32 %v4658_v4, %v4657_v30  ;;  %v2378_v28 = vsel %vm2352_vm3, %v2027_v39, %v2377_v31  ;;  %v4659_v21 = vmax.f32 %v3961_v1, 0.0  ;;  %v1806_v44 = vmul.f32 %v4661_v42, %v1286_v59 }
 0x1e5   : > { %v2041_v56 = vmax.f32 %v2039_v51, %v2040_v16  ;;  %v2054_v49 = vrot.slane %v2053_v27, 1  ;;  %v2379_v53 = vsel %vm2354_vm4, %v2034_v25, %v2378_v28  ;;  %v1807_v50 = vmul.f32 %v4662_v7, %v1287_v8  ;;  %v4664_v16 = vld [vmem:[#allocation74_spill] sm:$0xff] }
 0x1e6   : > { %v1805_v6 = vmul.f32 %v4660_v11, %v4659_v21  ;;  %v2048_v20 = vmax.f32 %v2046_v34, %v2047_v29  ;;  %v2059_v12 = vrot.slane %v3989_v38, 2  ;;  %v2066_v63 = vrot.slane %v3994_v52, 2 }
 0x1e7   : > { %v2070_v58 = vsel %vm287_vm0, %v3984_v62, -inf  ;;  %v2055_v55 = vmax.f32 %v2053_v27, %v2054_v49  ;;  %v2380_v1 = vsel %vm2356_vm5, %v2041_v56, %v2379_v53  ;;  %v2077_v19 = vsel %vm287_vm0, %v4663_v15, -inf  ;;  %v4665_v27 = vld [vmem:[#allocation87_spill] sm:$0xff] }
 0x1e8   : > { %v2071_v3 = vrot.slane %v2070_v58, 4  ;;  %v2381_v9 = vsel %vm2358_vm6, %v2048_v20, %v2380_v1  ;;  %v2060_v41 = vmax.f32 %v3989_v38, %v2059_v12  ;;  %v2067_v37 = vmax.f32 %v3994_v52, %v2066_v63 }
 0x1e9   : > { %v2078_v47 = vrot.slane %v2077_v19, 4  ;;  %v2382_v13 = vsel %vm2360_vm7, %v2055_v55, %v2381_v9  ;;  %v2084_v2 = vsel %vm287_vm0, %v1804_v43, -inf  ;;  %v2091_v62 = vsel %vm287_vm0, %v1805_v6, -inf  ;;  %v4667_v55 = vld [vmem:[#allocation28_spill] sm:$0xff] }
 0x1ea   : > { %v2072_v61 = vmax.f32 %v2070_v58, %v2071_v3  ;;  %2814 = vmatmul.mubr.msk.f32.gmra.mrb[2].mxu1 %vm287_vm0, %v2382_v13  ;;  %v2061_v14 = vrot.slane %v2060_v41, 1  ;;  %v2068_v33 = vrot.slane %v2067_v37, 1  ;;  %v2085_v45 = vrot.slane %v2084_v2, 4  ;;  %v4669_v3 = vld [vmem:[#allocation53_spill] sm:$0xff] }
 0x1eb   : > { %v2079_v5 = vmax.f32 %v2077_v19, %v2078_v47  ;;  %v2092_v59 = vrot.slane %v2091_v62, 4  ;;  %v2098_v38 = vsel %vm287_vm0, %v1806_v44, -inf  ;;  %v2105_v52 = vsel %vm287_vm0, %v1807_v50, -inf  ;;  %v4666_v44 = vld [vmem:[#allocation75_spill] sm:$0xff] }
 0x1ec   : > { %v2073_v26 = vrot.slane %v2072_v61, 2  ;;  %v2062_v48 = vmax.f32 %v2060_v41, %v2061_v14  ;;  %v2069_v22 = vmax.f32 %v2067_v37, %v2068_v33  ;;  %v2086_v0 = vmax.f32 %v2084_v2, %v2085_v45  ;;  %v4673_v33 = vld [vmem:[#allocation60_spill] sm:$0xff] }
 0x1ed   : > { %v2080_v51 = vrot.slane %v2079_v5, 2  ;;  %v2093_v34 = vmax.f32 %v2091_v62, %v2092_v59  ;;  %v2099_v8 = vrot.slane %v2098_v38, 4  ;;  %v2106_v30 = vrot.slane %v2105_v52, 4  ;;  %v4672_v62 = vld [vmem:[#allocation57_spill] sm:$0xff] }
 0x1ee   : > { %v2074_v39 = vmax.f32 %v2072_v61, %v2073_v26  ;;  %v2087_v43 = vrot.slane %v2086_v0, 2  ;;  %v2383_v25 = vsel %vm2348_vm1, %v2069_v22, %v2062_v48  ;;  %v1230_v31 = vadd.f32 %v4665_v27, %v4664_v16  ;;  %v4670_v61 = vld [vmem:[#allocation71_spill] sm:$0xff]  ;;  %v4675_v22 = vld [vmem:[#allocation42_spill] sm:$0xff] }
 0x1ef   : > { %v2081_v4 = vmax.f32 %v2079_v5, %v2080_v51  ;;  %v2094_v28 = vrot.slane %v2093_v34, 2  ;;  %v2100_v21 = vmax.f32 %v2098_v38, %v2099_v8  ;;  %v2107_v11 = vmax.f32 %v2105_v52, %v2106_v30  ;;  %v4674_v38 = vld [vmem:[#allocation72_spill] sm:$0xff] }
 0x1f0   : > { %v2075_v29 = vrot.slane %v2074_v39, 1  ;;  %v2088_v42 = vmax.f32 %v2086_v0, %v2087_v43  ;;  %v1231_v56 = vadd.f32 %v4665_v27, %v4666_v44  ;;  %v1294_v49 = vmax.f32 %v1230_v31, 0.0  ;;  %v4676_v0 = vld [vmem:[#allocation10_spill] sm:$0xff] }
 0x1f1   : > { %v2082_v6 = vrot.slane %v2081_v4, 1  ;;  %v2095_v7 = vmax.f32 %v2093_v34, %v2094_v28  ;;  %v2101_v50 = vrot.slane %v2100_v21, 2  ;;  %v2108_v20 = vrot.slane %v2107_v11, 2  ;;  %v4677_v34 = vld [vmem:[#allocation32_spill] sm:$0xff]  ;;  %v4678_v31 = vld [vmem:[#allocation34_spill] sm:$0xff] }
 0x1f2   : > { %v2076_v53 = vmax.f32 %v2074_v39, %v2075_v29  ;;  %v2089_v63 = vrot.slane %v2088_v42, 1  ;;  %v1295_v58 = vmax.f32 %v1231_v56, 0.0  ;;  %v4668_v1 = vmax.f32 %v4667_v55, 0.0 }
 0x1f3   : > { %v2083_v12 = vmax.f32 %v2081_v4, %v2082_v6  ;;  %v2096_v19 = vrot.slane %v2095_v7, 1  ;;  %v2102_v9 = vmax.f32 %v2100_v21, %v2101_v50  ;;  %v2109_v41 = vmax.f32 %v2107_v11, %v2108_v20 }
 0x1f4   : > { %v1812_v15 = vmul.f32 %v4669_v3, %v4668_v1  ;;  %v2384_v37 = vsel %vm2350_vm2, %v2076_v53, %v2383_v25  ;;  %v2090_v47 = vmax.f32 %v2088_v42, %v2089_v63  ;;  %v4671_v2 = vmax.f32 %v4670_v61, 0.0  ;;  %v4680_v61 = vld [vmem:[#allocation70_spill] sm:$0xff] }
 0x1f5   : > { %v2385_v13 = vsel %vm2352_vm3, %v2083_v12, %v2384_v37  ;;  %v1814_v5 = vmul.f32 %v4673_v33, %v1294_v49  ;;  %v2097_v45 = vmax.f32 %v2095_v7, %v2096_v19  ;;  %v2103_v26 = vrot.slane %v2102_v9, 1 }
 0x1f6   : > { %v1813_v14 = vmul.f32 %v4672_v62, %v4671_v2  ;;  %v2110_v59 = vrot.slane %v2109_v41, 1  ;;  %v1815_v52 = vmul.f32 %v4674_v38, %v1295_v58  ;;  %v2386_v48 = vsel %vm2354_vm4, %v2090_v47, %v2385_v13 }
 0x1f7   : > { %v2115_v51 = vrot.slane %v4675_v22, 2  ;;  %v2122_v39 = vrot.slane %v4676_v0, 2  ;;  %v2126_v8 = vsel %vm287_vm0, %v4677_v34, -inf  ;;  %v2104_v30 = vmax.f32 %v2102_v9, %v2103_v26 }
 0x1f8   : > { %v2111_v4 = vmax.f32 %v2109_v41, %v2110_v59  ;;  %v2387_v43 = vsel %vm2356_vm5, %v2097_v45, %v2386_v48  ;;  %v2127_v25 = vrot.slane %v2126_v8, 4  ;;  %v2133_v29 = vsel %vm287_vm0, %v4678_v31, -inf }
 0x1f9   : > { %v2116_v16 = vmax.f32 %v4675_v22, %v2115_v51  ;;  %v2123_v27 = vmax.f32 %v4676_v0, %v2122_v39  ;;  %v2140_v28 = vsel %vm287_vm0, %v1812_v15, -inf  ;;  %v2388_v21 = vsel %vm2358_vm6, %v2104_v30, %v2387_v43 }
 0x1fa   : > { %v2128_v11 = vmax.f32 %v2126_v8, %v2127_v25  ;;  %v2134_v6 = vrot.slane %v2133_v29, 4  ;;  %v2141_v42 = vrot.slane %v2140_v28, 4  ;;  %v2389_v44 = vsel %vm2360_vm7, %v2111_v4, %v2388_v21 }
 0x1fb   : > { %v2117_v56 = vrot.slane %v2116_v16, 1  ;;  %v2124_v49 = vrot.slane %v2123_v27, 1  ;;  %v2147_v53 = vsel %vm287_vm0, %v1813_v14, -inf  ;;  %2816 = vmatprep.mubr.msk.f32.mxu1 %vm287_vm0, %v2389_v44  ;;  %v2154_v55 = vsel %vm287_vm0, %v1814_v5, -inf }
 0x1fc   : > { %v2129_v7 = vrot.slane %v2128_v11, 2  ;;  %v2135_v50 = vmax.f32 %v2133_v29, %v2134_v6  ;;  %v2142_v20 = vmax.f32 %v2140_v28, %v2141_v42  ;;  %v2148_v12 = vrot.slane %v2147_v53, 4 }
 0x1fd   : > { %v2118_v63 = vmax.f32 %v2116_v16, %v2117_v56  ;;  %v2125_v58 = vmax.f32 %v2123_v27, %v2124_v49  ;;  %v2161_v1 = vsel %vm287_vm0, %v1815_v52, -inf  ;;  %v2155_v41 = vrot.slane %v2154_v55, 4 }
 0x1fe   : > { %v2130_v3 = vmax.f32 %v2128_v11, %v2129_v7  ;;  %v2136_v15 = vrot.slane %v2135_v50, 2  ;;  %v2143_v19 = vrot.slane %v2142_v20, 2  ;;  %v2149_v9 = vmax.f32 %v2147_v53, %v2148_v12 }
 0x1ff   : > { %v2162_v37 = vrot.slane %v2161_v1, 4  ;;  %v2390_v47 = vsel %vm2348_vm1, %v2125_v58, %v2118_v63  ;;  %v4679_v13 = vmax.f32 %v4016_v36, 0.0  ;;  %v2156_v26 = vmax.f32 %v2154_v55, %v2155_v41 }
 0x200   : > { %v2131_v62 = vrot.slane %v2130_v3, 1  ;;  %v2137_v14 = vmax.f32 %v2135_v50, %v2136_v15  ;;  %v2144_v33 = vmax.f32 %v2142_v20, %v2143_v19  ;;  %v2150_v45 = vrot.slane %v2149_v9, 2 }
 0x201   : > { %v1820_v2 = vmul.f32 %v4680_v61, %v4679_v13  ;;  %v2163_v5 = vmax.f32 %v2161_v1, %v2162_v37  ;;  %v2171_v59 = vrot.slane %v4069_v17, 2  ;;  %v2178_v38 = vrot.slane %v4073_v54, 2  ;;  %v4681_v61 = vld [vmem:[#allocation35_spill] sm:$0xff] }
 0x202   : > { %v2132_v52 = vmax.f32 %v2130_v3, %v2131_v62  ;;  %v2138_v48 = vrot.slane %v2137_v14, 1  ;;  %v2145_v22 = vrot.slane %v2144_v33, 1  ;;  %v2151_v51 = vmax.f32 %v2149_v9, %v2150_v45 }
 0x203   : > { %v2157_v0 = vrot.slane %v2156_v26, 2  ;;  %v2164_v39 = vrot.slane %v2163_v5, 2  ;;  %v2172_v36 = vmax.f32 %v4069_v17, %v2171_v59  ;;  %v2179_v34 = vmax.f32 %v4073_v54, %v2178_v38  ;;  %v4682_v38 = vld [vmem:[#allocation30_spill] sm:$0xff] }
 0x204   : > { %v2139_v8 = vmax.f32 %v2137_v14, %v2138_v48  ;;  %v2146_v30 = vmax.f32 %v2144_v33, %v2145_v22  ;;  %v2152_v4 = vrot.slane %v2151_v51, 1  ;;  %v2391_v43 = vsel %vm2350_vm2, %v2132_v52, %v2390_v47 }
 0x205   : > { %v2158_v25 = vmax.f32 %v2156_v26, %v2157_v0  ;;  %v2165_v16 = vmax.f32 %v2163_v5, %v2164_v39  ;;  %v2173_v27 = vrot.slane %v2172_v36, 1  ;;  %v2180_v31 = vrot.slane %v2179_v34, 1 }
 0x206   : > { %v2153_v29 = vmax.f32 %v2151_v51, %v2152_v4  ;;  %v2392_v28 = vsel %vm2352_vm3, %v2139_v8, %v2391_v43  ;;  %v2182_v21 = vsel %vm287_vm0, %v4064_v32, -inf  ;;  %v2189_v17 = vsel %vm287_vm0, %v4067_v24, -inf }
 0x207   : > { %v2159_v11 = vrot.slane %v2158_v25, 1  ;;  %v2166_v54 = vrot.slane %v2165_v16, 1  ;;  %v2393_v6 = vsel %vm2354_vm4, %v2146_v30, %v2392_v28  ;;  %v2174_v42 = vmax.f32 %v2172_v36, %v2173_v27 }
 0x208   : > { %v2394_v44 = vsel %vm2356_vm5, %v2153_v29, %v2393_v6  ;;  %v2181_v56 = vmax.f32 %v2179_v34, %v2180_v31  ;;  %v2183_v49 = vrot.slane %v2182_v21, 4  ;;  %v2190_v53 = vrot.slane %v2189_v17, 4 }
 0x209   : > { %v2160_v7 = vmax.f32 %v2158_v25, %v2159_v11  ;;  %v2167_v50 = vmax.f32 %v2165_v16, %v2166_v54  ;;  %v2196_v20 = vsel %vm287_vm0, %v1820_v2, -inf  ;;  %v2203_v32 = vsel %vm287_vm0, %v4034_v35, -inf }
 0x20a   : > { %v2184_v12 = vmax.f32 %v2182_v21, %v2183_v49  ;;  %v2191_v63 = vmax.f32 %v2189_v17, %v2190_v53  ;;  %v2197_v24 = vrot.slane %v2196_v20, 4  ;;  %v2204_v58 = vrot.slane %v2203_v32, 4 }
 0x20b   : > { %v2395_v55 = vsel %vm2358_vm6, %v2160_v7, %v2394_v44  ;;  %v2397_v1 = vsel %vm2348_vm1, %v2181_v56, %v2174_v42  ;;  %v2227_v3 = vrot.slane %v4052_v57, 2  ;;  %v2234_v15 = vrot.slane %v4061_v10, 2 }
 0x20c   : > { %v2396_v19 = vsel %vm2360_vm7, %v2167_v50, %v2395_v55  ;;  %v2185_v9 = vrot.slane %v2184_v12, 2  ;;  %v2192_v41 = vrot.slane %v2191_v63, 2  ;;  %v2198_v37 = vmax.f32 %v2196_v20, %v2197_v24 }
 0x20d   : > { %2817 = vmatmul.mubr.msk.f32.gmra.mrb[4].mxu1 %vm287_vm0, %v2396_v19  ;;  %v2205_v35 = vmax.f32 %v2203_v32, %v2204_v58  ;;  %v2228_v47 = vmax.f32 %v4052_v57, %v2227_v3  ;;  %v2235_v13 = vmax.f32 %v4061_v10, %v2234_v15  ;;  %v2238_v2 = vsel %vm287_vm0, %v4681_v61, -inf }
 0x20e   : > { %v2186_v62 = vmax.f32 %v2184_v12, %v2185_v9  ;;  %v2193_v14 = vmax.f32 %v2191_v63, %v2192_v41  ;;  %v2199_v33 = vrot.slane %v2198_v37, 2  ;;  %v2239_v45 = vrot.slane %v2238_v2, 4  ;;  %v4686_v12 = vld [vmem:[#allocation36_spill] sm:$0xff] }
 0x20f   : > { %v2206_v26 = vrot.slane %v2205_v35, 2  ;;  %v2229_v5 = vrot.slane %v2228_v47, 1  ;;  %v2236_v59 = vrot.slane %v2235_v13, 1  ;;  %v2245_v52 = vsel %vm287_vm0, %v4682_v38, -inf }
 0x210   : > { %v2187_v48 = vrot.slane %v2186_v62, 1  ;;  %v2194_v22 = vrot.slane %v2193_v14, 1  ;;  %v2200_v51 = vmax.f32 %v2198_v37, %v2199_v33  ;;  %v2240_v0 = vmax.f32 %v2238_v2, %v2239_v45 }
 0x211   : > { %v2207_v57 = vmax.f32 %v2205_v35, %v2206_v26  ;;  %v2230_v39 = vmax.f32 %v2228_v47, %v2229_v5  ;;  %v2237_v10 = vmax.f32 %v2235_v13, %v2236_v59  ;;  %v2246_v36 = vrot.slane %v2245_v52, 4  ;;  %v2751_v59 = vld [vmem:[%s4418_s5] ss:$0 sm:$0xff] }
 0x212   : > { %v2222_v34 = vrot.slane %v4093_v60, 1  ;;  %v2188_v8 = vmax.f32 %v2186_v62, %v2187_v48  ;;  %v2201_v30 = vrot.slane %v2200_v51, 1  ;;  %v2241_v4 = vrot.slane %v2240_v0, 2 }
 0x213   : > { %v2195_v43 = vmax.f32 %v2193_v14, %v2194_v22  ;;  %v2208_v25 = vrot.slane %v2207_v57, 1  ;;  %v2247_v16 = vmax.f32 %v2245_v52, %v2246_v36  ;;  %v2404_v27 = vsel %vm2348_vm1, %v2237_v10, %v2230_v39  ;;  %v4688_v10 = vld [vmem:[#allocation14_spill] sm:$0xff] }
 0x214   : > { %v4683_v31 = vrot.slane %v4055_v40, 2  ;;  %v2202_v28 = vmax.f32 %v2200_v51, %v2201_v30  ;;  %v2398_v21 = vsel %vm2350_vm2, %v2188_v8, %v2397_v1  ;;  %v2242_v17 = vmax.f32 %v2240_v0, %v2241_v4  ;;  %v4689_v8 = vld [vmem:[#allocation16_spill] sm:$0xff]  ;;  %v4690_v4 = vld [vmem:[#allocation17_spill] sm:$0xff] }
 0x215   : > { %v4684_v11 = vrot.slane %v4095_v23, 2  ;;  %v2209_v6 = vmax.f32 %v2207_v57, %v2208_v25  ;;  %v2399_v42 = vsel %vm2352_vm3, %v2195_v43, %v2398_v21  ;;  %v2248_v44 = vrot.slane %v2247_v16, 2  ;;  %v4687_v57 = vld [vmem:[#allocation12_spill] sm:$0xff] }
 0x216   : > { %v2270_v29 = vmax.f32 %v4055_v40, %v4683_v31  ;;  %v4685_v56 = vrot.slane %v4071_v46, 1  ;;  %v2400_v53 = vsel %vm2354_vm4, %v2202_v28, %v2399_v42  ;;  %v2243_v7 = vrot.slane %v2242_v17, 1 }
 0x217   : > { %v2277_v54 = vmax.f32 %v4095_v23, %v4684_v11  ;;  %v2264_v40 = vrot.slane %v4083_v18, 1  ;;  %v2223_v50 = vmax.f32 %v4093_v60, %v2222_v34  ;;  %v2401_v20 = vsel %vm2356_vm5, %v2209_v6, %v2400_v53 }
 0x218   : > { %v2216_v49 = vmax.f32 %v4071_v46, %v4685_v56  ;;  %v2249_v32 = vmax.f32 %v2247_v16, %v2248_v44  ;;  %v2257_v23 = vrot.slane %v4686_v12, 1  ;;  %v2271_v63 = vrot.slane %v2270_v29, 1 }
 0x219   : > { %v2244_v58 = vmax.f32 %v2242_v17, %v2243_v7  ;;  %v2278_v55 = vrot.slane %v2277_v54, 1  ;;  %v2265_v15 = vmax.f32 %v4083_v18, %v2264_v40  ;;  %v4691_v17 = vld [vmem:[#allocation20_spill] sm:$0xff]  ;;  %v4693_v7 = vld [vmem:[#allocation23_spill] sm:$0xff] }
 0x21a   : > { %v2402_v24 = vsel %vm2358_vm6, %v2216_v49, %v2401_v20  ;;  %v2250_v46 = vrot.slane %v2249_v32, 1  ;;  %v2258_v19 = vmax.f32 %v4686_v12, %v2257_v23  ;;  %v2272_v9 = vmax.f32 %v2270_v29, %v2271_v63 }
 0x21b   : > { %v2403_v1 = vsel %vm2360_vm7, %v2223_v50, %v2402_v24  ;;  %v2405_v3 = vsel %vm2350_vm2, %v2244_v58, %v2404_v27  ;;  %v2279_v41 = vmax.f32 %v2277_v54, %v2278_v55  ;;  %v4692_v54 = vld [vmem:[#allocation21_spill] sm:$0xff] }
 0x21c   : > { %2819 = vmatprep.mubr.msk.f32.mxu1 %vm287_vm0, %v2403_v1  ;;  %v2251_v60 = vmax.f32 %v2249_v32, %v2250_v46  ;;  %v4694_v50 = vld [vmem:[#allocation25_spill] sm:$0xff] }
 0x21e   : > { %v2406_v37 = vsel %vm2352_vm3, %v2251_v60, %v2405_v3 }
 0x21f   : > { %v2407_v35 = vsel %vm2354_vm4, %v2258_v19, %v2406_v37 }
 0x220   : > { %v2408_v47 = vsel %vm2356_vm5, %v2265_v15, %v2407_v35 }
 0x221   : > { %v2409_v13 = vsel %vm2358_vm6, %v2272_v9, %v2408_v47 }
 0x222   : > { %v2410_v61 = vsel %vm2360_vm7, %v2279_v41, %v2409_v13 }
 0x223   : > { %2820 = vmatmul.mubr.msk.f32.gmra.mrb[6].mxu1 %vm287_vm0, %v2410_v61 }
 0x29c   : > { %v2812_v2 = vpop.f32.mrb[0].mxu1 }
 0x29d   : > { %v2493_v62 = vpop.f32.mrb[1].mxu1  ;;  %2542 = vrot.lane.b32.xlu1 %v2812_v2, %s2948_s26 }
 0x29e   : > { %2540 = vrot.lane.b32.xlu0 %v2493_v62, %s2948_s26 }
 0x2bd   : > { %v2815_v18 = vpop.f32.mrb[2].mxu1 }
 0x2be   : > { %v2503_v14 = vpop.f32.mrb[3].mxu1  ;;  %2546 = vrot.lane.b32.xlu1 %v2815_v18, %s2948_s26 }
 0x2bf   : > { %2544 = vrot.lane.b32.xlu0 %v2503_v14, %s2948_s26 }
 0x2e0   : > { %v2818_v33 = vpop.f32.mrb[4].mxu1 }
 0x2e1   : > { %v2513_v45 = vpop.f32.mrb[5].mxu1  ;;  %2550 = vrot.lane.b32.xlu1 %v2818_v33, %s2948_s26 }
 0x2e2   : > { %2548 = vrot.lane.b32.xlu0 %v2513_v45, %s2948_s26 }
 0x2f6   : > { %v2821_v26 = vpop.f32.mrb[6].mxu1 }
 0x2f7   : > { %2554 = vrot.lane.b32.xlu1 %v2821_v26, %s2948_s26  ;;  %v2523_v5 = vpop.f32.mrb[7].mxu1 }
 0x2f8   : > { %2552 = vrot.lane.b32.xlu0 %v2523_v5, %s2948_s26 }
 0x2fc   : > { %2578 = vrot.lane.b32.xlu0 %v2751_v59, %s2948_s26 }
 0x30f   : > { %v2543_v48 = vpop.permute.xlu1 %2542 }
 0x310   : > { %v2541_v38 = vpop.permute.xlu0 %2540  ;;  %v2565_v39 = vadd.f32 %v4687_v57, %v2543_v48 }
 0x311   : > { %v2564_v36 = vadd.f32 %v2541_v38, %v4688_v10 }
 0x330   : > { %v2547_v51 = vpop.permute.xlu1 %2546 }
 0x331   : > { %v2545_v52 = vpop.permute.xlu0 %2544  ;;  %v2567_v30 = vadd.f32 %v4689_v8, %v2547_v51 }
 0x332   : > { %v2566_v43 = vadd.f32 %v2545_v52, %v4690_v4 }
 0x353   : > { %v2551_v27 = vpop.permute.xlu1 %2550 }
 0x354   : > { %v2549_v22 = vpop.permute.xlu0 %2548  ;;  %v2569_v11 = vadd.f32 %v4691_v17, %v2551_v27 }
 0x355   : > { %v2568_v6 = vadd.f32 %v2549_v22, %v4692_v54 }
 0x369   : > { %v2555_v42 = vpop.permute.xlu1 %2554 }
 0x36a   : > { %v2553_v0 = vpop.permute.xlu0 %2552  ;;  %v2571_v40 = vadd.f32 %v4693_v7, %v2555_v42 }
 0x36b   : > { %v2570_v20 = vadd.f32 %v2553_v0, %v4694_v50 }
 0x36e   : > { %v2579_v34 = vpop.permute.xlu0 %2578 }
 0x36f   : > { %v2582_v25 = vadd.f32 %v2579_v34, %v2565_v39  ;;  %v2581_v16 = vadd.f32 %v2579_v34, %v2564_v36  ;;  %v2584_v28 = vadd.f32 %v2579_v34, %v2567_v30  ;;  %v2583_v21 = vadd.f32 %v2579_v34, %v2566_v43 }
 0x370   : > { %v2586_v49 = vadd.f32 %v2579_v34, %v2569_v11  ;;  %v2585_v53 = vadd.f32 %v2579_v34, %v2568_v6  ;;  %v2588_v23 = vadd.f32 %v2579_v34, %v2571_v40  ;;  %v2587_v63 = vadd.f32 %v2579_v34, %v2570_v20 }
 0x371   : > { %v2590_v31 = vmax.f32 %v2582_v25, 0.0  ;;  %v2589_v29 = vmax.f32 %v2581_v16, 0.0  ;;  %v2592_v44 = vmax.f32 %v2584_v28, 0.0  ;;  %v2591_v56 = vmax.f32 %v2583_v21, 0.0 }
 0x372   : > { %v2594_v32 = vmax.f32 %v2586_v49, 0.0  ;;  %v2593_v12 = vmax.f32 %v2585_v53, 0.0  ;;  %v2596_v24 = vmax.f32 %v2588_v23, 0.0  ;;  %v2595_v58 = vmax.f32 %v2587_v63, 0.0 }
 0x373   : > { %2607 = vrot.lane.b32.xlu0 %v2590_v31, %s2948_s26  ;;  %2605 = vrot.lane.b32.xlu1 %v2589_v29, %s2948_s26 }
 0x377   : > { %2611 = vrot.lane.b32.xlu0 %v2592_v44, %s2948_s26  ;;  %2609 = vrot.lane.b32.xlu1 %v2591_v56, %s2948_s26 }
 0x37b   : > { %2615 = vrot.lane.b32.xlu0 %v2594_v32, %s2948_s26  ;;  %2613 = vrot.lane.b32.xlu1 %v2593_v12, %s2948_s26 }
 0x37f   : > { %2619 = vrot.lane.b32.xlu0 %v2596_v24, %s2948_s26  ;;  %2617 = vrot.lane.b32.xlu1 %v2595_v58, %s2948_s26 }
 0x3e5   : > { %v2608_v55 = vpop.permute.xlu0 %2607  ;;  %v2606_v1 = vpop.permute.xlu1 %2605 }
 0x3e6   : > { %2630 = vst.msk [vmem:[%s261_s11 + $0x8] sm:$0xff] %vm287_vm0, %v2608_v55  ;;  %2629 = vst.msk [vmem:[%s261_s11] sm:$0xff] %vm287_vm0, %v2606_v1 }
 0x3e9   : > { %v2612_v46 = vpop.permute.xlu0 %2611  ;;  %v2610_v3 = vpop.permute.xlu1 %2609 }
 0x3ea   : > { %2632 = vst.msk [vmem:[%s261_s11 + $0x18] sm:$0xff] %vm287_vm0, %v2612_v46  ;;  %2631 = vst.msk [vmem:[%s261_s11 + $0x10] sm:$0xff] %vm287_vm0, %v2610_v3 }
 0x3ed   : > { %v2616_v15 = vpop.permute.xlu0 %2615  ;;  %v2614_v60 = vpop.permute.xlu1 %2613 }
 0x3ee   : > { %2634 = vst.msk [vmem:[%s261_s11 + $0x28] sm:$0xff] %vm287_vm0, %v2616_v15  ;;  %2633 = vst.msk [vmem:[%s261_s11 + $0x20] sm:$0xff] %vm287_vm0, %v2614_v60 }
 0x3f1   : > { %v2620_v19 = vpop.permute.xlu0 %2619  ;;  %v2618_v9 = vpop.permute.xlu1 %2617 }
 0x3f2   : > { %2636 = vst.msk [vmem:[%s261_s11 + $0x38] sm:$0xff] %vm287_vm0, %v2620_v19  ;;  %2635 = vst.msk [vmem:[%s261_s11 + $0x30] sm:$0xff] %vm287_vm0, %v2618_v9 }
 0x3f3   : > { %2895 = shalt.err (!%p2892_p3)
}
 0x3f4   : > { %s2896_s26 = scalar_lea.hbm %s4366_s16, 1024  ;;  %s2900_s9 = scalar_lea.hbm %s4419_s6, 2048 }
 0x3f5   : > { %p2897_p4 = scmp.ne.s32.totalorder %s4366_s16, %s2896_s26  ;;  %p2901_p9 = scmp.lt.u32.totalorder %s4366_s16, %s4419_s6 }
 0x3f6   : > { %p2902_p10 = scmp.lt.u32.totalorder %s2900_s9, %s2896_s26  ;;  %p2904_p12 = scmp.lt.u32.totalorder %s2896_s26, %s4366_s16 }
 0x3f7   : > { %p2898_p7 = pnand %p2897_p4, %p3025_p5 }
 0x3f8   : > { %p2903_p11 = por %p2902_p10, %p2901_p9 }
 0x3f9   : > { %p2899_p8 = pneg %p2898_p7 }
 0x3fa   : > { %p2905_p13 = por %p2904_p12, %p2903_p11 }
 0x3fc   : > { %p2906_p0 = pnand %p2905_p13, %p2899_p8 }
 0x3fe   : > { %2909 = shalt.err (!%p2906_p0)
}
 0x3ff   : > { %s2950_s12 = smov 128   ;;  %s2951_s14 = smov 8  }
 0x400   : > { %2838 = dma.vmem_to_hbm [thread:$0]  (%p3025_p5), %s4368_s13, 1024, %s4366_s16, %s4372_s25, %s2950_s12, %s2950_s12, %s2951_s14  }
 0x401 PF: > { %p2844_p1 = scmp.ge.s32.totalorder %s2944_s24, 2  ;;  %s2666_s15 = sand.u32 1, %s2932_s21  }
 0x402   : > { %s2667_s17 = scalar_lea.sflag [#allocation3], %s2666_s15 }
 0x403   : > { %p2841_p2 = pnand %p2844_p1, %p3029_p6 }
 0x405   : > { %2927 = dma.done.wait (!%p2841_p2), %s2667_s17, 1024  }
 0x406   : > { %2929 = vsyncadd (!%p2841_p2), %s2667_s17, 4294966272  ;;  %p16_p3 = scmp.ge.s32.totalorder %s3012_s27, 4   ;;  %s4695_s21 = smov %s2936_s22 }
 0x407   : > { %s4696_s22 = smov %s2940_s23  ;;  %s4697_s23 = smov %s3023_s30 }
 0x408   : > { %s4698_s24 = smov %s3012_s27  ;;  %18 = sbr.rel (!%p16_p3) target bundleno = 3 (0x3), region = 82 }
 0x40f   :  { %2672 = vsyncpa [#allocation3], 1 }
 0x410   :  { %2674 = vsyncpa [#allocation3 + $0x1], 1 }

</bundles_post_ra>
